<compile_context>
chip_gen: v6e
topology: v6e:2x2x1
jax: 0.10.0
libtpu: 0.0.40
codegen_flags: <defaults>
</compile_context>

<pallas_src>
import math

import numpy as np

import jax
import jax.numpy as jnp
from jax import lax
from jax.experimental import pallas as pl
from jax.experimental.pallas import tpu as pltpu

# ----------------------------- small config ---------------------------------
B, S = 2, 8            # batch, sequence
H = 32                 # hidden_size
NH = 4                 # num_heads
DH = H // NH           # head dim
FF = 128               # filter_size (4 * H)
L = 2                  # num_hidden_layers
V = 256                # vocab_size
MAXPOS = 16            # max_position_embeddings
EPS = 1e-5             # layer_norm_epsilon
INIT_RANGE = 0.02
BS = B * S
SCALE = 1.0 / math.sqrt(DH)
GRP = 128 // NH        # per-head column group width in the fused QKV weight
QKVP = NH * GRP        # padded fused-QKV output width (= 128 lanes)


# ----------------------------- kernel helpers --------------------------------
def _layernorm(x, g, b, eps=EPS):
    mu = jnp.mean(x, axis=-1, keepdims=True)
    var = jnp.mean(jnp.square(x - mu), axis=-1, keepdims=True)
    return (x - mu) * lax.rsqrt(var + eps) * g + b


def _gelu(x):
    # GELU, tanh approximation.
    # TODO(synk): nn.GELU() defaults to the exact erf form; switch to lax.erf
    # if/when the erf primitive lowers in Mosaic for exact parity.
    c = math.sqrt(2.0 / math.pi)
    return 0.5 * x * (1.0 + jnp.tanh(c * (x + 0.044715 * x * x * x)))


# --------------------- fused decoder + ln_f + lm_head kernel -----------------
def gpt2_stack_kernel(x_ref, mask_ref,
                      ln1g_ref, ln1b_ref, wqkv_ref, bqkv_ref, wo_ref, bo_ref,
                      ln2g_ref, ln2b_ref, w1_ref, b1_ref, w2_ref, b2_ref,
                      lnfg_ref, lnfb_ref, wlm_ref,
                      logits_ref):
    x = x_ref[...]            # (BS, H) fp32 residual stream (VMEM/vreg resident)
    neg = mask_ref[...]       # (BS, BS) additive causal + batch-block mask

    # Fully-unrolled static layer loop (L == 2).  At real depths, restore a
    # layer grid axis (or lax.fori_loop) to bound VMEM live ranges.
    for l in range(L):
        # ---------------- self-attention block (pre-LN) ----------------
        h = _layernorm(x, ln1g_ref[l], ln1b_ref[l])
        # Fused QKV: one (BS,H)x(H,128) MXU matmul + one full-lane bias add.
        # Columns are head-major groups [q_h | k_h | v_h | pad]; Q pre-scaled
        # by 1/sqrt(DH) at init.
        qkv = jnp.dot(h.astype(jnp.bfloat16), wqkv_ref[l],
                      preferred_element_type=jnp.float32) + bqkv_ref[l]  # (BS,128)

        # Head gather: NH wide (3*DH) slices + one axis-0 stack.
        heads = jnp.stack(
            [qkv[:, g * GRP: g * GRP + 3 * DH] for g in range(NH)],
            axis=0)                                            # (NH, BS, 3*DH)
        q = heads[:, :, 0:DH]
        k = heads[:, :, DH:2 * DH]
        v = heads[:, :, 2 * DH:3 * DH]

        # Batch folded into the score M/N dims: NH batched (BS,DH)x(DH,BS)
        # micro-matmuls (not NH*B); cross-batch pairs are masked below.
        s = jnp.einsum('hqd,hkd->hqk',
                       q.astype(jnp.bfloat16), k.astype(jnp.bfloat16),
                       preferred_element_type=jnp.float32)     # (NH, BS, BS)
        s = s + neg[None, :, :]                                # fp32 mask add
        m = jnp.max(s, axis=-1, keepdims=True)                 # fp32 softmax
        e = jnp.exp(s - m)
        p = e * pl.reciprocal(jnp.sum(e, axis=-1, keepdims=True), approx=True)
        ctx = jnp.einsum('hqk,hkd->hqd',
                         p.astype(jnp.bfloat16), v.astype(jnp.bfloat16),
                         preferred_element_type=jnp.float32)   # (NH, BS, DH)

        # Output projection: wo holds the NH row blocks of the single (H, H)
        # matrix; block einsum + cross-head sum == that one matmul.
        attn = jnp.einsum('hnd,hdk->hnk',
                          ctx.astype(jnp.bfloat16), wo_ref[l],
                          preferred_element_type=jnp.float32)  # (NH, BS, H)
        x = x + jnp.sum(attn, axis=0) + bo_ref[l]              # residual (fp32)

        # ---------------- feed-forward block (pre-LN) ----------------
        h2 = _layernorm(x, ln2g_ref[l], ln2b_ref[l])
        f = jnp.dot(h2.astype(jnp.bfloat16), w1_ref[l],
                    preferred_element_type=jnp.float32) + b1_ref[l]
        f = _gelu(f)
        f = jnp.dot(f.astype(jnp.bfloat16), w2_ref[l],
                    preferred_element_type=jnp.float32) + b2_ref[l]
        x = x + f

    # ---------------- ln_f + tied lm_head (lane-dense 2x128 output) ----------
    hf = _layernorm(x, lnfg_ref[...], lnfb_ref[...])
    logits_ref[...] = jnp.dot(hf.astype(jnp.bfloat16), wlm_ref[...],
                              preferred_element_type=jnp.float32)


# ----------------------- host-precomputed constants --------------------------
def _build_neg_mask():
    # Additive mask over the batch-folded token axis (n = b*S + s):
    # allowed iff same batch and key position <= query position.
    n = np.arange(BS)
    same_b = (n[:, None] // S) == (n[None, :] // S)
    causal = (n[None, :] % S) <= (n[:, None] % S)
    return np.where(same_b & causal, 0.0, -1e9).astype(np.float32)


_NEG_MASK = jnp.asarray(_build_neg_mask())    # (BS, BS), 1 KB


# ------------------------------- forward glue ---------------------------------
@jax.jit
def gpt2_forward(input_ids, params):
    # Embedding gathers + (identity) dropout stay as plain JAX glue.
    pos = jnp.arange(S)
    x = params['wte'][input_ids] + params['wpe'][pos][None, :, :]
    x2d = x.reshape(BS, H).astype(jnp.float32)

    logits2d = pl.pallas_call(
        gpt2_stack_kernel,
        out_shape=jax.ShapeDtypeStruct((BS, V), jnp.float32),
        # Grid-less call: every input is a whole-array VMEM block; the kernel
        # runs exactly once (no per-step pipeline overhead at this size).
        in_specs=[pl.BlockSpec(memory_space=pltpu.MemorySpace.VMEM)] * 17,
        out_specs=pl.BlockSpec(memory_space=pltpu.MemorySpace.VMEM),
    )(x2d, _NEG_MASK,
      params['ln1_g'], params['ln1_b'], params['wqkv'], params['bqkv'],
      params['wo'], params['bo'], params['ln2_g'], params['ln2_b'],
      params['w1'], params['b1'], params['w2'], params['b2'],
      params['lnf_g'], params['lnf_b'], params['wlm'])

    return logits2d.reshape(B, S, V)


# ----------------------------- parameter init --------------------------------
def init_params(key):
    ks = jax.random.split(key, 8)
    std_emb = INIT_RANGE
    std_attn = INIT_RANGE / math.sqrt(2 * L)
    std_ffn = INIT_RANGE
    bf16 = jnp.bfloat16

    def n(k, shape, std):
        return std * jax.random.normal(k, shape, jnp.float32)

    wte = n(ks[0], (V, H), std_emb)          # fp32 master embedding (tied head)

    # Fused QKV weight: head-major column groups [q_h | k_h | v_h | pad],
    # zero-padded to 128 output lanes; 1/sqrt(DH) baked into the Q columns
    # (would also apply to the Q bias if it were nonzero).
    wq = n(ks[2], (L, H, NH, DH), std_attn) * SCALE
    wk = n(ks[3], (L, H, NH, DH), std_attn)
    wv = n(ks[4], (L, H, NH, DH), std_attn)
    pad = jnp.zeros((L, H, NH, GRP - 3 * DH), jnp.float32)
    wqkv = jnp.concatenate([wq, wk, wv, pad], axis=-1).reshape(L, H, QKVP)

    return dict(
        wte=wte,
        # lm_head tied to wte (share_embedding_weights=True); transposed and
        # cast to bf16 ONCE here so there is no per-call HBM transpose pass.
        wlm=wte.T.astype(bf16),                                 # (H, V)
        wpe=n(ks[1], (MAXPOS, H), std_emb),
        ln1_g=jnp.ones((L, 1, H), jnp.float32),
        ln1_b=jnp.zeros((L, 1, H), jnp.float32),
        wqkv=wqkv.astype(bf16),                                 # (L, H, 128)
        bqkv=jnp.zeros((L, 1, QKVP), jnp.float32),
        # Out-projection stored as the NH row blocks of the (H, H) matrix,
        # rows ordered head-major to match the ctx (h, d) layout.
        wo=n(ks[5], (L, NH, DH, H), std_attn).astype(bf16),
        bo=jnp.zeros((L, 1, H), jnp.float32),
        ln2_g=jnp.ones((L, 1, H), jnp.float32),
        ln2_b=jnp.zeros((L, 1, H), jnp.float32),
        w1=n(ks[6], (L, H, FF), std_ffn).astype(bf16),
        b1=jnp.zeros((L, 1, FF), jnp.float32),
        w2=n(ks[7], (L, FF, H), std_ffn).astype(bf16),
        b2=jnp.zeros((L, 1, H), jnp.float32),
        lnf_g=jnp.ones((1, H), jnp.float32),
        lnf_b=jnp.zeros((1, H), jnp.float32),
    )


if __name__ == "__main__":
    key = jax.random.PRNGKey(0)
    pkey, ikey = jax.random.split(key)
    params = init_params(pkey)
    input_ids = jax.random.randint(ikey, (B, S), 0, V, dtype=jnp.int32)

    logits = jax.block_until_ready(gpt2_forward(input_ids, params))

    assert logits.shape == (B, S, V), logits.shape
    assert bool(jnp.all(jnp.isfinite(logits)))
    print("KERNEL_OK")
</pallas_src>

<mosaic_0001>
module attributes {stable_mosaic.version = 11 : i64} {
  func.func @gpt2_stack_kernel(%arg0: memref<16x32xf32, #tpu.memory_space<vmem>>, %arg1: memref<16x16xf32, #tpu.memory_space<vmem>>, %arg2: memref<2x1x32xf32, #tpu.memory_space<vmem>>, %arg3: memref<2x1x32xf32, #tpu.memory_space<vmem>>, %arg4: memref<2x32x128xbf16, #tpu.memory_space<vmem>>, %arg5: memref<2x1x128xf32, #tpu.memory_space<vmem>>, %arg6: memref<2x4x8x32xbf16, #tpu.memory_space<vmem>>, %arg7: memref<2x1x32xf32, #tpu.memory_space<vmem>>, %arg8: memref<2x1x32xf32, #tpu.memory_space<vmem>>, %arg9: memref<2x1x32xf32, #tpu.memory_space<vmem>>, %arg10: memref<2x32x128xbf16, #tpu.memory_space<vmem>>, %arg11: memref<2x1x128xf32, #tpu.memory_space<vmem>>, %arg12: memref<2x128x32xbf16, #tpu.memory_space<vmem>>, %arg13: memref<2x1x32xf32, #tpu.memory_space<vmem>>, %arg14: memref<1x32xf32, #tpu.memory_space<vmem>>, %arg15: memref<1x32xf32, #tpu.memory_space<vmem>>, %arg16: memref<32x256xbf16, #tpu.memory_space<vmem>>, %arg17: memref<16x256xf32, #tpu.memory_space<vmem>>) attributes {dimension_semantics = [], scalar_prefetch = 0 : i64, scratch_operands = 0 : i64, tpu.core_type = #tpu.core_type<tc>} {
    %c0 = arith.constant 0 : index
    %c0_0 = arith.constant 0 : index
    %0 = vector.load %arg0[%c0, %c0_0] : memref<16x32xf32, #tpu.memory_space<vmem>>, vector<16x32xf32>
    %c0_1 = arith.constant 0 : index
    %c0_2 = arith.constant 0 : index
    %1 = vector.load %arg1[%c0_1, %c0_2] : memref<16x16xf32, #tpu.memory_space<vmem>>, vector<16x16xf32>
    %c0_3 = arith.constant 0 : index
    %c0_4 = arith.constant 0 : index
    %c0_5 = arith.constant 0 : index
    %2 = vector.load %arg2[%c0_3, %c0_4, %c0_5] : memref<2x1x32xf32, #tpu.memory_space<vmem>>, vector<1x1x32xf32>
    %3 = vector.shape_cast %2 : vector<1x1x32xf32> to vector<1x32xf32>
    %c0_6 = arith.constant 0 : index
    %c0_7 = arith.constant 0 : index
    %c0_8 = arith.constant 0 : index
    %4 = vector.load %arg3[%c0_6, %c0_7, %c0_8] : memref<2x1x32xf32, #tpu.memory_space<vmem>>, vector<1x1x32xf32>
    %5 = vector.shape_cast %4 : vector<1x1x32xf32> to vector<1x32xf32>
    %cst = arith.constant dense<0.000000e+00> : vector<16xf32>
    %6 = vector.multi_reduction <add>, %0, %cst [1] : vector<16x32xf32> to vector<16xf32>
    %7 = vector.shape_cast %6 : vector<16xf32> to vector<16x1xf32>
    %cst_9 = arith.constant 3.200000e+01 : f32
    %8 = vector.broadcast %cst_9 : f32 to vector<16x1xf32>
    %9 = arith.divf %7, %8 : vector<16x1xf32>
    %10 = vector.broadcast %9 : vector<16x1xf32> to vector<16x32xf32>
    %11 = arith.subf %0, %10 : vector<16x32xf32>
    %12 = arith.mulf %11, %11 : vector<16x32xf32>
    %cst_10 = arith.constant dense<0.000000e+00> : vector<16xf32>
    %13 = vector.multi_reduction <add>, %12, %cst_10 [1] : vector<16x32xf32> to vector<16xf32>
    %14 = vector.shape_cast %13 : vector<16xf32> to vector<16x1xf32>
    %cst_11 = arith.constant 3.200000e+01 : f32
    %15 = vector.broadcast %cst_11 : f32 to vector<16x1xf32>
    %16 = arith.divf %14, %15 : vector<16x1xf32>
    %17 = vector.broadcast %9 : vector<16x1xf32> to vector<16x32xf32>
    %18 = arith.subf %0, %17 : vector<16x32xf32>
    %cst_12 = arith.constant 9.99999974E-6 : f32
    %19 = vector.broadcast %cst_12 : f32 to vector<16x1xf32>
    %20 = arith.addf %16, %19 : vector<16x1xf32>
    %21 = math.rsqrt %20 : vector<16x1xf32>
    %22 = vector.broadcast %21 : vector<16x1xf32> to vector<16x32xf32>
    %23 = arith.mulf %18, %22 : vector<16x32xf32>
    %24 = vector.broadcast %3 : vector<1x32xf32> to vector<16x32xf32>
    %25 = arith.mulf %23, %24 : vector<16x32xf32>
    %26 = vector.broadcast %5 : vector<1x32xf32> to vector<16x32xf32>
    %27 = arith.addf %25, %26 : vector<16x32xf32>
    %28 = arith.truncf %27 : vector<16x32xf32> to vector<16x32xbf16>
    %c0_13 = arith.constant 0 : index
    %c0_14 = arith.constant 0 : index
    %c0_15 = arith.constant 0 : index
    %29 = vector.load %arg4[%c0_13, %c0_14, %c0_15] : memref<2x32x128xbf16, #tpu.memory_space<vmem>>, vector<1x32x128xbf16>
    %30 = vector.shape_cast %29 : vector<1x32x128xbf16> to vector<32x128xbf16>
    %cst_16 = arith.constant dense<0.000000e+00> : vector<16x128xf32>
    %31 = tpu.matmul %28, %30, %cst_16 {dimension_numbers = #tpu.dot_dimension_numbers<[1], [0], [0], [1], [0, 0, 1, 1], [], []>} : vector<16x32xbf16>, vector<32x128xbf16>, vector<16x128xf32> -> vector<16x128xf32>
    %c0_17 = arith.constant 0 : index
    %c0_18 = arith.constant 0 : index
    %c0_19 = arith.constant 0 : index
    %32 = vector.load %arg5[%c0_17, %c0_18, %c0_19] : memref<2x1x128xf32, #tpu.memory_space<vmem>>, vector<1x1x128xf32>
    %33 = vector.shape_cast %32 : vector<1x1x128xf32> to vector<1x128xf32>
    %34 = vector.broadcast %33 : vector<1x128xf32> to vector<16x128xf32>
    %35 = arith.addf %31, %34 : vector<16x128xf32>
    %36 = vector.extract_strided_slice %35 {offsets = [0, 0], sizes = [16, 24], strides = [1, 1]} : vector<16x128xf32> to vector<16x24xf32>
    %37 = vector.extract_strided_slice %35 {offsets = [0, 32], sizes = [16, 24], strides = [1, 1]} : vector<16x128xf32> to vector<16x24xf32>
    %38 = vector.extract_strided_slice %35 {offsets = [0, 64], sizes = [16, 24], strides = [1, 1]} : vector<16x128xf32> to vector<16x24xf32>
    %39 = vector.extract_strided_slice %35 {offsets = [0, 96], sizes = [16, 24], strides = [1, 1]} : vector<16x128xf32> to vector<16x24xf32>
    %40 = vector.shape_cast %36 : vector<16x24xf32> to vector<1x16x24xf32>
    %41 = vector.shape_cast %37 : vector<16x24xf32> to vector<1x16x24xf32>
    %42 = vector.shape_cast %38 : vector<16x24xf32> to vector<1x16x24xf32>
    %43 = vector.shape_cast %39 : vector<16x24xf32> to vector<1x16x24xf32>
    %44 = tpu.concatenate %40, %41, %42, %43 in 0 : vector<1x16x24xf32>, vector<1x16x24xf32>, vector<1x16x24xf32>, vector<1x16x24xf32> -> vector<4x16x24xf32>
    %45 = vector.extract_strided_slice %44 {offsets = [0, 0, 0], sizes = [4, 16, 8], strides = [1, 1, 1]} : vector<4x16x24xf32> to vector<4x16x8xf32>
    %46 = vector.extract_strided_slice %44 {offsets = [0, 0, 8], sizes = [4, 16, 8], strides = [1, 1, 1]} : vector<4x16x24xf32> to vector<4x16x8xf32>
    %47 = vector.extract_strided_slice %44 {offsets = [0, 0, 16], sizes = [4, 16, 8], strides = [1, 1, 1]} : vector<4x16x24xf32> to vector<4x16x8xf32>
    %48 = arith.truncf %45 : vector<4x16x8xf32> to vector<4x16x8xbf16>
    %49 = arith.truncf %46 : vector<4x16x8xf32> to vector<4x16x8xbf16>
    "tpu.trace_start"() <{level = 10 : i32, message = "hqd,hkd->hqk"}> : () -> ()
    %cst_20 = arith.constant dense<0.000000e+00> : vector<4x16x16xf32>
    %50 = tpu.matmul %48, %49, %cst_20 {dimension_numbers = #tpu.dot_dimension_numbers<[2], [2], [1], [1], [0, 0, 0, 1, 1, 1], [0], [0]>} : vector<4x16x8xbf16>, vector<4x16x8xbf16>, vector<4x16x16xf32> -> vector<4x16x16xf32>
    "tpu.trace_stop"() : () -> ()
    %51 = vector.shape_cast %1 : vector<16x16xf32> to vector<1x16x16xf32>
    %52 = vector.broadcast %51 : vector<1x16x16xf32> to vector<4x16x16xf32>
    %53 = arith.addf %50, %52 : vector<4x16x16xf32>
    %cst_21 = arith.constant dense<0xFF800000> : vector<4x16xf32>
    %54 = vector.multi_reduction <maximumf>, %53, %cst_21 [2] : vector<4x16x16xf32> to vector<4x16xf32>
    %55 = vector.shape_cast %54 : vector<4x16xf32> to vector<4x16x1xf32>
    %56 = vector.broadcast %55 : vector<4x16x1xf32> to vector<4x16x16xf32>
    %57 = arith.subf %53, %56 : vector<4x16x16xf32>
    %58 = math.exp %57 : vector<4x16x16xf32>
    %cst_22 = arith.constant dense<0.000000e+00> : vector<4x16xf32>
    %59 = vector.multi_reduction <add>, %58, %cst_22 [2] : vector<4x16x16xf32> to vector<4x16xf32>
    %60 = vector.shape_cast %59 : vector<4x16xf32> to vector<4x16x1xf32>
    %61 = tpu.reciprocal %60 {approx = true} : vector<4x16x1xf32> -> vector<4x16x1xf32>
    %62 = vector.broadcast %61 : vector<4x16x1xf32> to vector<4x16x16xf32>
    %63 = arith.mulf %58, %62 : vector<4x16x16xf32>
    %64 = arith.truncf %63 : vector<4x16x16xf32> to vector<4x16x16xbf16>
    %65 = arith.truncf %47 : vector<4x16x8xf32> to vector<4x16x8xbf16>
    "tpu.trace_start"() <{level = 10 : i32, message = "hqk,hkd->hqd"}> : () -> ()
    %cst_23 = arith.constant dense<0.000000e+00> : vector<4x16x8xf32>
    %66 = tpu.matmul %64, %65, %cst_23 {dimension_numbers = #tpu.dot_dimension_numbers<[2], [1], [1], [2], [0, 0, 0, 1, 1, 2], [0], [0]>} : vector<4x16x16xbf16>, vector<4x16x8xbf16>, vector<4x16x8xf32> -> vector<4x16x8xf32>
    "tpu.trace_stop"() : () -> ()
    %67 = arith.truncf %66 : vector<4x16x8xf32> to vector<4x16x8xbf16>
    %c0_24 = arith.constant 0 : index
    %c0_25 = arith.constant 0 : index
    %c0_26 = arith.constant 0 : index
    %c0_27 = arith.constant 0 : index
    %68 = vector.load %arg6[%c0_24, %c0_25, %c0_26, %c0_27] : memref<2x4x8x32xbf16, #tpu.memory_space<vmem>>, vector<1x4x8x32xbf16>
    %69 = vector.shape_cast %68 : vector<1x4x8x32xbf16> to vector<4x8x32xbf16>
    "tpu.trace_start"() <{level = 10 : i32, message = "hnd,hdk->hnk"}> : () -> ()
    %cst_28 = arith.constant dense<0.000000e+00> : vector<4x16x32xf32>
    %70 = tpu.matmul %67, %69, %cst_28 {dimension_numbers = #tpu.dot_dimension_numbers<[2], [1], [1], [2], [0, 0, 0, 1, 1, 2], [0], [0]>} : vector<4x16x8xbf16>, vector<4x8x32xbf16>, vector<4x16x32xf32> -> vector<4x16x32xf32>
    "tpu.trace_stop"() : () -> ()
    %cst_29 = arith.constant dense<0.000000e+00> : vector<16x32xf32>
    %71 = vector.multi_reduction <add>, %70, %cst_29 [0] : vector<4x16x32xf32> to vector<16x32xf32>
    %72 = arith.addf %0, %71 : vector<16x32xf32>
    %c0_30 = arith.constant 0 : index
    %c0_31 = arith.constant 0 : index
    %c0_32 = arith.constant 0 : index
    %73 = vector.load %arg7[%c0_30, %c0_31, %c0_32] : memref<2x1x32xf32, #tpu.memory_space<vmem>>, vector<1x1x32xf32>
    %74 = vector.shape_cast %73 : vector<1x1x32xf32> to vector<1x32xf32>
    %75 = vector.broadcast %74 : vector<1x32xf32> to vector<16x32xf32>
    %76 = arith.addf %72, %75 : vector<16x32xf32>
    %c0_33 = arith.constant 0 : index
    %c0_34 = arith.constant 0 : index
    %c0_35 = arith.constant 0 : index
    %77 = vector.load %arg8[%c0_33, %c0_34, %c0_35] : memref<2x1x32xf32, #tpu.memory_space<vmem>>, vector<1x1x32xf32>
    %78 = vector.shape_cast %77 : vector<1x1x32xf32> to vector<1x32xf32>
    %c0_36 = arith.constant 0 : index
    %c0_37 = arith.constant 0 : index
    %c0_38 = arith.constant 0 : index
    %79 = vector.load %arg9[%c0_36, %c0_37, %c0_38] : memref<2x1x32xf32, #tpu.memory_space<vmem>>, vector<1x1x32xf32>
    %80 = vector.shape_cast %79 : vector<1x1x32xf32> to vector<1x32xf32>
    %cst_39 = arith.constant dense<0.000000e+00> : vector<16xf32>
    %81 = vector.multi_reduction <add>, %76, %cst_39 [1] : vector<16x32xf32> to vector<16xf32>
    %82 = vector.shape_cast %81 : vector<16xf32> to vector<16x1xf32>
    %cst_40 = arith.constant 3.200000e+01 : f32
    %83 = vector.broadcast %cst_40 : f32 to vector<16x1xf32>
    %84 = arith.divf %82, %83 : vector<16x1xf32>
    %85 = vector.broadcast %84 : vector<16x1xf32> to vector<16x32xf32>
    %86 = arith.subf %76, %85 : vector<16x32xf32>
    %87 = arith.mulf %86, %86 : vector<16x32xf32>
    %cst_41 = arith.constant dense<0.000000e+00> : vector<16xf32>
    %88 = vector.multi_reduction <add>, %87, %cst_41 [1] : vector<16x32xf32> to vector<16xf32>
    %89 = vector.shape_cast %88 : vector<16xf32> to vector<16x1xf32>
    %cst_42 = arith.constant 3.200000e+01 : f32
    %90 = vector.broadcast %cst_42 : f32 to vector<16x1xf32>
    %91 = arith.divf %89, %90 : vector<16x1xf32>
    %92 = vector.broadcast %84 : vector<16x1xf32> to vector<16x32xf32>
    %93 = arith.subf %76, %92 : vector<16x32xf32>
    %cst_43 = arith.constant 9.99999974E-6 : f32
    %94 = vector.broadcast %cst_43 : f32 to vector<16x1xf32>
    %95 = arith.addf %91, %94 : vector<16x1xf32>
    %96 = math.rsqrt %95 : vector<16x1xf32>
    %97 = vector.broadcast %96 : vector<16x1xf32> to vector<16x32xf32>
    %98 = arith.mulf %93, %97 : vector<16x32xf32>
    %99 = vector.broadcast %78 : vector<1x32xf32> to vector<16x32xf32>
    %100 = arith.mulf %98, %99 : vector<16x32xf32>
    %101 = vector.broadcast %80 : vector<1x32xf32> to vector<16x32xf32>
    %102 = arith.addf %100, %101 : vector<16x32xf32>
    %103 = arith.truncf %102 : vector<16x32xf32> to vector<16x32xbf16>
    %c0_44 = arith.constant 0 : index
    %c0_45 = arith.constant 0 : index
    %c0_46 = arith.constant 0 : index
    %104 = vector.load %arg10[%c0_44, %c0_45, %c0_46] : memref<2x32x128xbf16, #tpu.memory_space<vmem>>, vector<1x32x128xbf16>
    %105 = vector.shape_cast %104 : vector<1x32x128xbf16> to vector<32x128xbf16>
    %cst_47 = arith.constant dense<0.000000e+00> : vector<16x128xf32>
    %106 = tpu.matmul %103, %105, %cst_47 {dimension_numbers = #tpu.dot_dimension_numbers<[1], [0], [0], [1], [0, 0, 1, 1], [], []>} : vector<16x32xbf16>, vector<32x128xbf16>, vector<16x128xf32> -> vector<16x128xf32>
    %c0_48 = arith.constant 0 : index
    %c0_49 = arith.constant 0 : index
    %c0_50 = arith.constant 0 : index
    %107 = vector.load %arg11[%c0_48, %c0_49, %c0_50] : memref<2x1x128xf32, #tpu.memory_space<vmem>>, vector<1x1x128xf32>
    %108 = vector.shape_cast %107 : vector<1x1x128xf32> to vector<1x128xf32>
    %109 = vector.broadcast %108 : vector<1x128xf32> to vector<16x128xf32>
    %110 = arith.addf %106, %109 : vector<16x128xf32>
    %cst_51 = arith.constant 5.000000e-01 : f32
    %111 = vector.broadcast %cst_51 : f32 to vector<16x128xf32>
    %112 = arith.mulf %111, %110 : vector<16x128xf32>
    %cst_52 = arith.constant 4.471500e-02 : f32
    %113 = vector.broadcast %cst_52 : f32 to vector<16x128xf32>
    %114 = arith.mulf %113, %110 : vector<16x128xf32>
    %115 = arith.mulf %114, %110 : vector<16x128xf32>
    %116 = arith.mulf %115, %110 : vector<16x128xf32>
    %117 = arith.addf %110, %116 : vector<16x128xf32>
    %cst_53 = arith.constant 0.797884583 : f32
    %118 = vector.broadcast %cst_53 : f32 to vector<16x128xf32>
    %119 = arith.mulf %118, %117 : vector<16x128xf32>
    %120 = math.tanh %119 : vector<16x128xf32>
    %cst_54 = arith.constant 1.000000e+00 : f32
    %121 = vector.broadcast %cst_54 : f32 to vector<16x128xf32>
    %122 = arith.addf %121, %120 : vector<16x128xf32>
    %123 = arith.mulf %112, %122 : vector<16x128xf32>
    %124 = arith.truncf %123 : vector<16x128xf32> to vector<16x128xbf16>
    %c0_55 = arith.constant 0 : index
    %c0_56 = arith.constant 0 : index
    %c0_57 = arith.constant 0 : index
    %125 = vector.load %arg12[%c0_55, %c0_56, %c0_57] : memref<2x128x32xbf16, #tpu.memory_space<vmem>>, vector<1x128x32xbf16>
    %126 = vector.shape_cast %125 : vector<1x128x32xbf16> to vector<128x32xbf16>
    %cst_58 = arith.constant dense<0.000000e+00> : vector<16x32xf32>
    %127 = tpu.matmul %124, %126, %cst_58 {dimension_numbers = #tpu.dot_dimension_numbers<[1], [0], [0], [1], [0, 0, 1, 1], [], []>} : vector<16x128xbf16>, vector<128x32xbf16>, vector<16x32xf32> -> vector<16x32xf32>
    %c0_59 = arith.constant 0 : index
    %c0_60 = arith.constant 0 : index
    %c0_61 = arith.constant 0 : index
    %128 = vector.load %arg13[%c0_59, %c0_60, %c0_61] : memref<2x1x32xf32, #tpu.memory_space<vmem>>, vector<1x1x32xf32>
    %129 = vector.shape_cast %128 : vector<1x1x32xf32> to vector<1x32xf32>
    %130 = vector.broadcast %129 : vector<1x32xf32> to vector<16x32xf32>
    %131 = arith.addf %127, %130 : vector<16x32xf32>
    %132 = arith.addf %76, %131 : vector<16x32xf32>
    %c1 = arith.constant 1 : index
    %c0_62 = arith.constant 0 : index
    %c0_63 = arith.constant 0 : index
    %133 = vector.load %arg2[%c1, %c0_62, %c0_63] : memref<2x1x32xf32, #tpu.memory_space<vmem>>, vector<1x1x32xf32>
    %134 = vector.shape_cast %133 : vector<1x1x32xf32> to vector<1x32xf32>
    %c1_64 = arith.constant 1 : index
    %c0_65 = arith.constant 0 : index
    %c0_66 = arith.constant 0 : index
    %135 = vector.load %arg3[%c1_64, %c0_65, %c0_66] : memref<2x1x32xf32, #tpu.memory_space<vmem>>, vector<1x1x32xf32>
    %136 = vector.shape_cast %135 : vector<1x1x32xf32> to vector<1x32xf32>
    %cst_67 = arith.constant dense<0.000000e+00> : vector<16xf32>
    %137 = vector.multi_reduction <add>, %132, %cst_67 [1] : vector<16x32xf32> to vector<16xf32>
    %138 = vector.shape_cast %137 : vector<16xf32> to vector<16x1xf32>
    %cst_68 = arith.constant 3.200000e+01 : f32
    %139 = vector.broadcast %cst_68 : f32 to vector<16x1xf32>
    %140 = arith.divf %138, %139 : vector<16x1xf32>
    %141 = vector.broadcast %140 : vector<16x1xf32> to vector<16x32xf32>
    %142 = arith.subf %132, %141 : vector<16x32xf32>
    %143 = arith.mulf %142, %142 : vector<16x32xf32>
    %cst_69 = arith.constant dense<0.000000e+00> : vector<16xf32>
    %144 = vector.multi_reduction <add>, %143, %cst_69 [1] : vector<16x32xf32> to vector<16xf32>
    %145 = vector.shape_cast %144 : vector<16xf32> to vector<16x1xf32>
    %cst_70 = arith.constant 3.200000e+01 : f32
    %146 = vector.broadcast %cst_70 : f32 to vector<16x1xf32>
    %147 = arith.divf %145, %146 : vector<16x1xf32>
    %148 = vector.broadcast %140 : vector<16x1xf32> to vector<16x32xf32>
    %149 = arith.subf %132, %148 : vector<16x32xf32>
    %cst_71 = arith.constant 9.99999974E-6 : f32
    %150 = vector.broadcast %cst_71 : f32 to vector<16x1xf32>
    %151 = arith.addf %147, %150 : vector<16x1xf32>
    %152 = math.rsqrt %151 : vector<16x1xf32>
    %153 = vector.broadcast %152 : vector<16x1xf32> to vector<16x32xf32>
    %154 = arith.mulf %149, %153 : vector<16x32xf32>
    %155 = vector.broadcast %134 : vector<1x32xf32> to vector<16x32xf32>
    %156 = arith.mulf %154, %155 : vector<16x32xf32>
    %157 = vector.broadcast %136 : vector<1x32xf32> to vector<16x32xf32>
    %158 = arith.addf %156, %157 : vector<16x32xf32>
    %159 = arith.truncf %158 : vector<16x32xf32> to vector<16x32xbf16>
    %c1_72 = arith.constant 1 : index
    %c0_73 = arith.constant 0 : index
    %c0_74 = arith.constant 0 : index
    %160 = vector.load %arg4[%c1_72, %c0_73, %c0_74] : memref<2x32x128xbf16, #tpu.memory_space<vmem>>, vector<1x32x128xbf16>
    %161 = vector.shape_cast %160 : vector<1x32x128xbf16> to vector<32x128xbf16>
    %cst_75 = arith.constant dense<0.000000e+00> : vector<16x128xf32>
    %162 = tpu.matmul %159, %161, %cst_75 {dimension_numbers = #tpu.dot_dimension_numbers<[1], [0], [0], [1], [0, 0, 1, 1], [], []>} : vector<16x32xbf16>, vector<32x128xbf16>, vector<16x128xf32> -> vector<16x128xf32>
    %c1_76 = arith.constant 1 : index
    %c0_77 = arith.constant 0 : index
    %c0_78 = arith.constant 0 : index
    %163 = vector.load %arg5[%c1_76, %c0_77, %c0_78] : memref<2x1x128xf32, #tpu.memory_space<vmem>>, vector<1x1x128xf32>
    %164 = vector.shape_cast %163 : vector<1x1x128xf32> to vector<1x128xf32>
    %165 = vector.broadcast %164 : vector<1x128xf32> to vector<16x128xf32>
    %166 = arith.addf %162, %165 : vector<16x128xf32>
    %167 = vector.extract_strided_slice %166 {offsets = [0, 0], sizes = [16, 24], strides = [1, 1]} : vector<16x128xf32> to vector<16x24xf32>
    %168 = vector.extract_strided_slice %166 {offsets = [0, 32], sizes = [16, 24], strides = [1, 1]} : vector<16x128xf32> to vector<16x24xf32>
    %169 = vector.extract_strided_slice %166 {offsets = [0, 64], sizes = [16, 24], strides = [1, 1]} : vector<16x128xf32> to vector<16x24xf32>
    %170 = vector.extract_strided_slice %166 {offsets = [0, 96], sizes = [16, 24], strides = [1, 1]} : vector<16x128xf32> to vector<16x24xf32>
    %171 = vector.shape_cast %167 : vector<16x24xf32> to vector<1x16x24xf32>
    %172 = vector.shape_cast %168 : vector<16x24xf32> to vector<1x16x24xf32>
    %173 = vector.shape_cast %169 : vector<16x24xf32> to vector<1x16x24xf32>
    %174 = vector.shape_cast %170 : vector<16x24xf32> to vector<1x16x24xf32>
    %175 = tpu.concatenate %171, %172, %173, %174 in 0 : vector<1x16x24xf32>, vector<1x16x24xf32>, vector<1x16x24xf32>, vector<1x16x24xf32> -> vector<4x16x24xf32>
    %176 = vector.extract_strided_slice %175 {offsets = [0, 0, 0], sizes = [4, 16, 8], strides = [1, 1, 1]} : vector<4x16x24xf32> to vector<4x16x8xf32>
    %177 = vector.extract_strided_slice %175 {offsets = [0, 0, 8], sizes = [4, 16, 8], strides = [1, 1, 1]} : vector<4x16x24xf32> to vector<4x16x8xf32>
    %178 = vector.extract_strided_slice %175 {offsets = [0, 0, 16], sizes = [4, 16, 8], strides = [1, 1, 1]} : vector<4x16x24xf32> to vector<4x16x8xf32>
    %179 = arith.truncf %176 : vector<4x16x8xf32> to vector<4x16x8xbf16>
    %180 = arith.truncf %177 : vector<4x16x8xf32> to vector<4x16x8xbf16>
    "tpu.trace_start"() <{level = 10 : i32, message = "hqd,hkd->hqk"}> : () -> ()
    %cst_79 = arith.constant dense<0.000000e+00> : vector<4x16x16xf32>
    %181 = tpu.matmul %179, %180, %cst_79 {dimension_numbers = #tpu.dot_dimension_numbers<[2], [2], [1], [1], [0, 0, 0, 1, 1, 1], [0], [0]>} : vector<4x16x8xbf16>, vector<4x16x8xbf16>, vector<4x16x16xf32> -> vector<4x16x16xf32>
    "tpu.trace_stop"() : () -> ()
    %182 = vector.shape_cast %1 : vector<16x16xf32> to vector<1x16x16xf32>
    %183 = vector.broadcast %182 : vector<1x16x16xf32> to vector<4x16x16xf32>
    %184 = arith.addf %181, %183 : vector<4x16x16xf32>
    %cst_80 = arith.constant dense<0xFF800000> : vector<4x16xf32>
    %185 = vector.multi_reduction <maximumf>, %184, %cst_80 [2] : vector<4x16x16xf32> to vector<4x16xf32>
    %186 = vector.shape_cast %185 : vector<4x16xf32> to vector<4x16x1xf32>
    %187 = vector.broadcast %186 : vector<4x16x1xf32> to vector<4x16x16xf32>
    %188 = arith.subf %184, %187 : vector<4x16x16xf32>
    %189 = math.exp %188 : vector<4x16x16xf32>
    %cst_81 = arith.constant dense<0.000000e+00> : vector<4x16xf32>
    %190 = vector.multi_reduction <add>, %189, %cst_81 [2] : vector<4x16x16xf32> to vector<4x16xf32>
    %191 = vector.shape_cast %190 : vector<4x16xf32> to vector<4x16x1xf32>
    %192 = tpu.reciprocal %191 {approx = true} : vector<4x16x1xf32> -> vector<4x16x1xf32>
    %193 = vector.broadcast %192 : vector<4x16x1xf32> to vector<4x16x16xf32>
    %194 = arith.mulf %189, %193 : vector<4x16x16xf32>
    %195 = arith.truncf %194 : vector<4x16x16xf32> to vector<4x16x16xbf16>
    %196 = arith.truncf %178 : vector<4x16x8xf32> to vector<4x16x8xbf16>
    "tpu.trace_start"() <{level = 10 : i32, message = "hqk,hkd->hqd"}> : () -> ()
    %cst_82 = arith.constant dense<0.000000e+00> : vector<4x16x8xf32>
    %197 = tpu.matmul %195, %196, %cst_82 {dimension_numbers = #tpu.dot_dimension_numbers<[2], [1], [1], [2], [0, 0, 0, 1, 1, 2], [0], [0]>} : vector<4x16x16xbf16>, vector<4x16x8xbf16>, vector<4x16x8xf32> -> vector<4x16x8xf32>
    "tpu.trace_stop"() : () -> ()
    %198 = arith.truncf %197 : vector<4x16x8xf32> to vector<4x16x8xbf16>
    %c1_83 = arith.constant 1 : index
    %c0_84 = arith.constant 0 : index
    %c0_85 = arith.constant 0 : index
    %c0_86 = arith.constant 0 : index
    %199 = vector.load %arg6[%c1_83, %c0_84, %c0_85, %c0_86] : memref<2x4x8x32xbf16, #tpu.memory_space<vmem>>, vector<1x4x8x32xbf16>
    %200 = vector.shape_cast %199 : vector<1x4x8x32xbf16> to vector<4x8x32xbf16>
    "tpu.trace_start"() <{level = 10 : i32, message = "hnd,hdk->hnk"}> : () -> ()
    %cst_87 = arith.constant dense<0.000000e+00> : vector<4x16x32xf32>
    %201 = tpu.matmul %198, %200, %cst_87 {dimension_numbers = #tpu.dot_dimension_numbers<[2], [1], [1], [2], [0, 0, 0, 1, 1, 2], [0], [0]>} : vector<4x16x8xbf16>, vector<4x8x32xbf16>, vector<4x16x32xf32> -> vector<4x16x32xf32>
    "tpu.trace_stop"() : () -> ()
    %cst_88 = arith.constant dense<0.000000e+00> : vector<16x32xf32>
    %202 = vector.multi_reduction <add>, %201, %cst_88 [0] : vector<4x16x32xf32> to vector<16x32xf32>
    %203 = arith.addf %132, %202 : vector<16x32xf32>
    %c1_89 = arith.constant 1 : index
    %c0_90 = arith.constant 0 : index
    %c0_91 = arith.constant 0 : index
    %204 = vector.load %arg7[%c1_89, %c0_90, %c0_91] : memref<2x1x32xf32, #tpu.memory_space<vmem>>, vector<1x1x32xf32>
    %205 = vector.shape_cast %204 : vector<1x1x32xf32> to vector<1x32xf32>
    %206 = vector.broadcast %205 : vector<1x32xf32> to vector<16x32xf32>
    %207 = arith.addf %203, %206 : vector<16x32xf32>
    %c1_92 = arith.constant 1 : index
    %c0_93 = arith.constant 0 : index
    %c0_94 = arith.constant 0 : index
    %208 = vector.load %arg8[%c1_92, %c0_93, %c0_94] : memref<2x1x32xf32, #tpu.memory_space<vmem>>, vector<1x1x32xf32>
    %209 = vector.shape_cast %208 : vector<1x1x32xf32> to vector<1x32xf32>
    %c1_95 = arith.constant 1 : index
    %c0_96 = arith.constant 0 : index
    %c0_97 = arith.constant 0 : index
    %210 = vector.load %arg9[%c1_95, %c0_96, %c0_97] : memref<2x1x32xf32, #tpu.memory_space<vmem>>, vector<1x1x32xf32>
    %211 = vector.shape_cast %210 : vector<1x1x32xf32> to vector<1x32xf32>
    %cst_98 = arith.constant dense<0.000000e+00> : vector<16xf32>
    %212 = vector.multi_reduction <add>, %207, %cst_98 [1] : vector<16x32xf32> to vector<16xf32>
    %213 = vector.shape_cast %212 : vector<16xf32> to vector<16x1xf32>
    %cst_99 = arith.constant 3.200000e+01 : f32
    %214 = vector.broadcast %cst_99 : f32 to vector<16x1xf32>
    %215 = arith.divf %213, %214 : vector<16x1xf32>
    %216 = vector.broadcast %215 : vector<16x1xf32> to vector<16x32xf32>
    %217 = arith.subf %207, %216 : vector<16x32xf32>
    %218 = arith.mulf %217, %217 : vector<16x32xf32>
    %cst_100 = arith.constant dense<0.000000e+00> : vector<16xf32>
    %219 = vector.multi_reduction <add>, %218, %cst_100 [1] : vector<16x32xf32> to vector<16xf32>
    %220 = vector.shape_cast %219 : vector<16xf32> to vector<16x1xf32>
    %cst_101 = arith.constant 3.200000e+01 : f32
    %221 = vector.broadcast %cst_101 : f32 to vector<16x1xf32>
    %222 = arith.divf %220, %221 : vector<16x1xf32>
    %223 = vector.broadcast %215 : vector<16x1xf32> to vector<16x32xf32>
    %224 = arith.subf %207, %223 : vector<16x32xf32>
    %cst_102 = arith.constant 9.99999974E-6 : f32
    %225 = vector.broadcast %cst_102 : f32 to vector<16x1xf32>
    %226 = arith.addf %222, %225 : vector<16x1xf32>
    %227 = math.rsqrt %226 : vector<16x1xf32>
    %228 = vector.broadcast %227 : vector<16x1xf32> to vector<16x32xf32>
    %229 = arith.mulf %224, %228 : vector<16x32xf32>
    %230 = vector.broadcast %209 : vector<1x32xf32> to vector<16x32xf32>
    %231 = arith.mulf %229, %230 : vector<16x32xf32>
    %232 = vector.broadcast %211 : vector<1x32xf32> to vector<16x32xf32>
    %233 = arith.addf %231, %232 : vector<16x32xf32>
    %234 = arith.truncf %233 : vector<16x32xf32> to vector<16x32xbf16>
    %c1_103 = arith.constant 1 : index
    %c0_104 = arith.constant 0 : index
    %c0_105 = arith.constant 0 : index
    %235 = vector.load %arg10[%c1_103, %c0_104, %c0_105] : memref<2x32x128xbf16, #tpu.memory_space<vmem>>, vector<1x32x128xbf16>
    %236 = vector.shape_cast %235 : vector<1x32x128xbf16> to vector<32x128xbf16>
    %cst_106 = arith.constant dense<0.000000e+00> : vector<16x128xf32>
    %237 = tpu.matmul %234, %236, %cst_106 {dimension_numbers = #tpu.dot_dimension_numbers<[1], [0], [0], [1], [0, 0, 1, 1], [], []>} : vector<16x32xbf16>, vector<32x128xbf16>, vector<16x128xf32> -> vector<16x128xf32>
    %c1_107 = arith.constant 1 : index
    %c0_108 = arith.constant 0 : index
    %c0_109 = arith.constant 0 : index
    %238 = vector.load %arg11[%c1_107, %c0_108, %c0_109] : memref<2x1x128xf32, #tpu.memory_space<vmem>>, vector<1x1x128xf32>
    %239 = vector.shape_cast %238 : vector<1x1x128xf32> to vector<1x128xf32>
    %240 = vector.broadcast %239 : vector<1x128xf32> to vector<16x128xf32>
    %241 = arith.addf %237, %240 : vector<16x128xf32>
    %cst_110 = arith.constant 5.000000e-01 : f32
    %242 = vector.broadcast %cst_110 : f32 to vector<16x128xf32>
    %243 = arith.mulf %242, %241 : vector<16x128xf32>
    %cst_111 = arith.constant 4.471500e-02 : f32
    %244 = vector.broadcast %cst_111 : f32 to vector<16x128xf32>
    %245 = arith.mulf %244, %241 : vector<16x128xf32>
    %246 = arith.mulf %245, %241 : vector<16x128xf32>
    %247 = arith.mulf %246, %241 : vector<16x128xf32>
    %248 = arith.addf %241, %247 : vector<16x128xf32>
    %cst_112 = arith.constant 0.797884583 : f32
    %249 = vector.broadcast %cst_112 : f32 to vector<16x128xf32>
    %250 = arith.mulf %249, %248 : vector<16x128xf32>
    %251 = math.tanh %250 : vector<16x128xf32>
    %cst_113 = arith.constant 1.000000e+00 : f32
    %252 = vector.broadcast %cst_113 : f32 to vector<16x128xf32>
    %253 = arith.addf %252, %251 : vector<16x128xf32>
    %254 = arith.mulf %243, %253 : vector<16x128xf32>
    %255 = arith.truncf %254 : vector<16x128xf32> to vector<16x128xbf16>
    %c1_114 = arith.constant 1 : index
    %c0_115 = arith.constant 0 : index
    %c0_116 = arith.constant 0 : index
    %256 = vector.load %arg12[%c1_114, %c0_115, %c0_116] : memref<2x128x32xbf16, #tpu.memory_space<vmem>>, vector<1x128x32xbf16>
    %257 = vector.shape_cast %256 : vector<1x128x32xbf16> to vector<128x32xbf16>
    %cst_117 = arith.constant dense<0.000000e+00> : vector<16x32xf32>
    %258 = tpu.matmul %255, %257, %cst_117 {dimension_numbers = #tpu.dot_dimension_numbers<[1], [0], [0], [1], [0, 0, 1, 1], [], []>} : vector<16x128xbf16>, vector<128x32xbf16>, vector<16x32xf32> -> vector<16x32xf32>
    %c1_118 = arith.constant 1 : index
    %c0_119 = arith.constant 0 : index
    %c0_120 = arith.constant 0 : index
    %259 = vector.load %arg13[%c1_118, %c0_119, %c0_120] : memref<2x1x32xf32, #tpu.memory_space<vmem>>, vector<1x1x32xf32>
    %260 = vector.shape_cast %259 : vector<1x1x32xf32> to vector<1x32xf32>
    %261 = vector.broadcast %260 : vector<1x32xf32> to vector<16x32xf32>
    %262 = arith.addf %258, %261 : vector<16x32xf32>
    %263 = arith.addf %207, %262 : vector<16x32xf32>
    %c0_121 = arith.constant 0 : index
    %c0_122 = arith.constant 0 : index
    %264 = vector.load %arg14[%c0_121, %c0_122] : memref<1x32xf32, #tpu.memory_space<vmem>>, vector<1x32xf32>
    %c0_123 = arith.constant 0 : index
    %c0_124 = arith.constant 0 : index
    %265 = vector.load %arg15[%c0_123, %c0_124] : memref<1x32xf32, #tpu.memory_space<vmem>>, vector<1x32xf32>
    %cst_125 = arith.constant dense<0.000000e+00> : vector<16xf32>
    %266 = vector.multi_reduction <add>, %263, %cst_125 [1] : vector<16x32xf32> to vector<16xf32>
    %267 = vector.shape_cast %266 : vector<16xf32> to vector<16x1xf32>
    %cst_126 = arith.constant 3.200000e+01 : f32
    %268 = vector.broadcast %cst_126 : f32 to vector<16x1xf32>
    %269 = arith.divf %267, %268 : vector<16x1xf32>
    %270 = vector.broadcast %269 : vector<16x1xf32> to vector<16x32xf32>
    %271 = arith.subf %263, %270 : vector<16x32xf32>
    %272 = arith.mulf %271, %271 : vector<16x32xf32>
    %cst_127 = arith.constant dense<0.000000e+00> : vector<16xf32>
    %273 = vector.multi_reduction <add>, %272, %cst_127 [1] : vector<16x32xf32> to vector<16xf32>
    %274 = vector.shape_cast %273 : vector<16xf32> to vector<16x1xf32>
    %cst_128 = arith.constant 3.200000e+01 : f32
    %275 = vector.broadcast %cst_128 : f32 to vector<16x1xf32>
    %276 = arith.divf %274, %275 : vector<16x1xf32>
    %277 = vector.broadcast %269 : vector<16x1xf32> to vector<16x32xf32>
    %278 = arith.subf %263, %277 : vector<16x32xf32>
    %cst_129 = arith.constant 9.99999974E-6 : f32
    %279 = vector.broadcast %cst_129 : f32 to vector<16x1xf32>
    %280 = arith.addf %276, %279 : vector<16x1xf32>
    %281 = math.rsqrt %280 : vector<16x1xf32>
    %282 = vector.broadcast %281 : vector<16x1xf32> to vector<16x32xf32>
    %283 = arith.mulf %278, %282 : vector<16x32xf32>
    %284 = vector.broadcast %264 : vector<1x32xf32> to vector<16x32xf32>
    %285 = arith.mulf %283, %284 : vector<16x32xf32>
    %286 = vector.broadcast %265 : vector<1x32xf32> to vector<16x32xf32>
    %287 = arith.addf %285, %286 : vector<16x32xf32>
    %288 = arith.truncf %287 : vector<16x32xf32> to vector<16x32xbf16>
    %c0_130 = arith.constant 0 : index
    %c0_131 = arith.constant 0 : index
    %289 = vector.load %arg16[%c0_130, %c0_131] : memref<32x256xbf16, #tpu.memory_space<vmem>>, vector<32x256xbf16>
    %cst_132 = arith.constant dense<0.000000e+00> : vector<16x256xf32>
    %290 = tpu.matmul %288, %289, %cst_132 {dimension_numbers = #tpu.dot_dimension_numbers<[1], [0], [0], [1], [0, 0, 1, 1], [], []>} : vector<16x32xbf16>, vector<32x256xbf16>, vector<16x256xf32> -> vector<16x256xf32>
    %c0_133 = arith.constant 0 : index
    %c0_134 = arith.constant 0 : index
    %291 = vector.load %arg17[%c0_133, %c0_134] : memref<16x256xf32, #tpu.memory_space<vmem>>, vector<16x256xf32>
    tpu.vector_store %arg17[%c0_133, %c0_134], %290 {strides = array<i32>} : memref<16x256xf32, #tpu.memory_space<vmem>>, vector<16x256xf32>,
    return
  }
}

</mosaic_0001>

<bundles_post_ra>
// kernel: gpt2_forward.1
= control target key start
LH: loop header
LB: loop body
LE: loop exit
PB: predicated region body
PF: predicated region fallthrough
CT: control target
= control target key end

     0   :  { %s3605_s0 = inlined_call_operand.vmem [shape: f32[16,32], index: 0, kind: input, shape index: {}]   ;;  %s3606_s1 = inlined_call_operand.vmem [shape: f32[16,16], index: 1, kind: input, shape index: {}]   ;;  %s3607_s2 = inlined_call_operand.vmem [shape: f32[2,1,32], index: 2, kind: input, shape index: {}]   ;;  %s3608_s3 = inlined_call_operand.vmem [shape: f32[2,1,32], index: 3, kind: input, shape index: {}]   ;;  %s3609_s4 = inlined_call_operand.vmem [shape: bf16[2,32,128], index: 4, kind: input, shape index: {}]   ;;  %s3610_s5 = inlined_call_operand.vmem [shape: f32[2,1,128], index: 5, kind: input, shape index: {}]   ;;  %s3611_s6 = inlined_call_operand.vmem [shape: bf16[2,4,8,32], index: 6, kind: input, shape index: {}]   ;;  %s3612_s7 = inlined_call_operand.vmem [shape: f32[2,1,32], index: 7, kind: input, shape index: {}]   ;;  %s3613_s8 = inlined_call_operand.vmem [shape: f32[2,1,32], index: 8, kind: input, shape index: {}]   ;;  %s3614_s9 = inlined_call_operand.vmem [shape: f32[2,1,32], index: 9, kind: input, shape index: {}]   ;;  %s3615_s10 = inlined_call_operand.vmem [shape: bf16[2,32,128], index: 10, kind: input, shape index: {}]   ;;  %s3616_s11 = inlined_call_operand.vmem [shape: f32[2,1,128], index: 11, kind: input, shape index: {}]   ;;  %s3617_s12 = inlined_call_operand.vmem [shape: bf16[2,128,32], index: 12, kind: input, shape index: {}]   ;;  %s3618_s13 = inlined_call_operand.vmem [shape: f32[2,1,32], index: 13, kind: input, shape index: {}]   ;;  %s3619_s14 = inlined_call_operand.vmem [shape: f32[1,32], index: 14, kind: input, shape index: {}]   ;;  %s3620_s15 = inlined_call_operand.vmem [shape: f32[1,32], index: 15, kind: input, shape index: {}]   ;;  %s3621_s16 = inlined_call_operand.vmem [shape: bf16[32,256], index: 16, kind: input, shape index: {}]   ;;  %s3622_s17 = inlined_call_operand.hbm [shape: f32[16,256], index: 17, kind: output, shape index: {}]  }
   0x1   :  { %3625 = sst [smem:[#allocation5_spill]] %s3605_s0 }
   0x2   :  { %3626 = sst [smem:[#allocation6_spill]] %s3606_s1 }
   0x3   :  { %s3627_s26 = sld [smem:[#allocation5_spill]]  ;;  %vm64_vm0 = vcmask 261120  }
   0x9   :  { %v3072_v0 = vld [vmem:[%s3627_s26] sm:$0xff]  ;;  %v3077_v1 = vld [vmem:[%s3627_s26 + $0x8] sm:$0xff] }
   0xa   :  { %v65_v2 = vsel %vm64_vm0, %v3072_v0, 0.0  ;;  %v68_v3 = vsel %vm64_vm0, %v3077_v1, 0.0 }
   0xb   :  { %66 = vadd.xlane.f32.xlu0 %v65_v2 }
   0xf   :  { %69 = vadd.xlane.f32.xlu0 %v68_v3 }
  0x10   :  { %22 = vsyncpa [#allocation3], 0  ;;  %v2824_v14 = vld [vmem:[%s3609_s4 + $0x8] sm:$0xff]   ;;  %v2968_v15 = vmov 0.0   ;;  %vm2969_vm1 = vmmov 0   ;;  %v2825_v16 = vld [vmem:[%s3609_s4] sm:$0xff]  }
  0x11   :  { %2567 = vmatprep.subr.bf16.mxu1 %v2968_v15  ;;  %2571 = vmatprep.mubr.msk.bf16.mxu1 %vm2969_vm1, %v2968_v15  ;;  %v2378_v25 = vld [vmem:[%s3607_s2] ss:$0 sm:$0xff]  ;;  %s2970_s24 = smov 64   ;;  %s2971_s25 = smov 96   ;;  %vm203_vm2 = vcmask 64512   ;;  %vm401_vm3 = vcmask 130048  }
  0x12   :  { %2568 = vmatpush3.bf16.msra.mxu1 %v2824_v14  ;;  %2581 = vmatprep.subr.bf16.mxu0 %v2968_v15  ;;  %v2379_v29 = vld [vmem:[%s3608_s3] ss:$0 sm:$0xff]  ;;  %s2972_s26 = smov 32   ;;  %s2973_s27 = smov 120   ;;  %vm693_vm4 = vcmask 1043456  }
  0x13   :  { %2569 = vmatprep.subr.bf16.mxu1 %v2968_v15  ;;  %2583 = vmatprep.mubr.msk.bf16.mxu0 %vm2969_vm1, %v2968_v15  ;;  %v2380_v35 = vld [vmem:[%s3610_s5] ss:$0 sm:$0xff]  ;;  %s3628_s0 = sld [smem:[#allocation6_spill]]  ;;  %s2974_s19 = smov 112  }
  0x16   :  { %2570 = vmatpush3.bf16.msra.mxu1 %v2825_v16 }
  0x17   :  { %2575 = vmatprep.subr.bf16.mxu1 %v2968_v15 }
  0x19   :  { %v3159_v63 = vld [vmem:[%s3628_s0] sm:$0xff] }
  0x94   :  { %v67_v4 = vpop.xlane.xlu0 %66 }
  0x95   :  { %v72_v5 = vmul.f32 0.03125, %v67_v4 }
  0x97   :  { %v74_v6 = vsub.f32 %v3072_v0, %v72_v5  ;;  %v3165_v5 = vld [vmem:[%s3628_s0 + $0x8] sm:$0xff] }
  0x98   :  { %v70_v7 = vpop.xlane.xlu0 %69 }
  0x99   :  { %v73_v8 = vmul.f32 0.03125, %v70_v7  ;;  %v76_v9 = vmul.f32 %v74_v6, %v74_v6 }
  0x9b   :  { %v75_v10 = vsub.f32 %v3077_v1, %v73_v8  ;;  %v78_v11 = vsel %vm64_vm0, %v76_v9, 0.0 }
  0x9c   :  { %79 = vadd.xlane.f32.xlu1 %v78_v11 }
  0x9d   :  { %v77_v12 = vmul.f32 %v75_v10, %v75_v10 }
  0x9f   :  { %v81_v13 = vsel %vm64_vm0, %v77_v12, 0.0 }
  0xa0   :  { %82 = vadd.xlane.f32.xlu1 %v81_v13 }
 0x125   :  { %v80_v17 = vpop.xlane.xlu1 %79 }
 0x126   :  { %v84_v18 = vmul.f32 0.03125, %v80_v17 }
 0x128   :  { %v86_v19 = vadd.f32 1e-05, %v84_v18 }
 0x129   :  { %v83_v20 = vpop.xlane.xlu1 %82 }
 0x12a   :  { %2854 = vrsqrt.f32 %v86_v19  ;;  %v85_v21 = vmul.f32 0.03125, %v83_v20 }
 0x12c   :  { %v87_v22 = vadd.f32 1e-05, %v85_v21 }
 0x12e   :  { %2856 = vrsqrt.f32 %v87_v22 }
 0x137   :  { %v2855_v23 = vpop.eup %2854 }
 0x138   :  { %v90_v24 = vmul.f32 %v2855_v23, %v74_v6 }
 0x13a   :  { %v98_v28 = vmul.f32 %v2378_v25, %v90_v24 }
 0x13b   :  { %v2857_v26 = vpop.eup %2856 }
 0x13c   :  { %v91_v27 = vmul.f32 %v2857_v26, %v75_v10  ;;  %v106_v31 = vadd.f32 %v2379_v29, %v98_v28 }
 0x13e   :  { %v99_v30 = vmul.f32 %v2378_v25, %v91_v27 }
 0x140   :  { %v107_v32 = vadd.f32 %v2379_v29, %v99_v30 }
 0x142   :  { %v108_v33 = vpack.c.bf16 %v107_v32, %v106_v31 }
 0x144   :  { %2572 = vmatmul.mubr.msk.bf16.vlgmr.msra.gmra.mxu1 %vm64_vm0, %v108_v33 }
 0x145   :  { %2577 = vmatprep.mubr.msk.bf16.mxu1 %vm2969_vm1, %v2968_v15 }
 0x204   :  { %v169_v34 = vpop.f32.mrf.mxu1 }
 0x205   :  { %v170_v38 = vadd.f32 %v2380_v35, %v169_v34 }
 0x206   :  { %v2573_v36 = vpop.f32.mrf.mxu1 }
 0x208   :  { %v172_v37 = vpop.f32.mrf.mxu1 }
 0x209   :  { %v173_v39 = vadd.f32 %v2380_v35, %v172_v37 }
 0x20a   :  { %v2574_v40 = vpop.f32.mrf.mxu1 }
 0x20b   :  { %v2799_v41 = vpack.i.bf16 %v173_v39, %v170_v38  ;;  %v3116_v42 = vpack.c.bf16 %v173_v39, %v170_v38 }
 0x20d   :  { %2800 = vrot.lane.b32.xlu1 %v2799_v41, %s2970_s24  ;;  %2795 = vrot.lane.b32.xlu0 %v2799_v41, %s2971_s25 }
 0x211   :  { %2805 = vrot.lane.b32.xlu1 %v2799_v41, %s2972_s26 }
 0x215   :  { %201 = vrot.lane.b32.xlu1 %v3116_v42, %s2973_s27 }
 0x27f   :  { %v2801_v43 = vpop.permute.xlu1 %2800  ;;  %v2796_v44 = vpop.permute.xlu0 %2795 }
 0x280   :  { %v2803_v45 = vunpack.i.h.bf16 %v2801_v43  ;;  %v2802_v46 = vunpack.i.l.bf16 %v2801_v43  ;;  %v2798_v47 = vunpack.i.h.bf16 %v2796_v44  ;;  %v2797_v48 = vunpack.i.l.bf16 %v2796_v44 }
 0x282   :  { %v3120_v49 = vpack.c.bf16 %v2803_v45, %v2802_v46  ;;  %v3122_v50 = vpack.c.bf16 %v2798_v47, %v2797_v48 }
 0x283   :  { %v2806_v51 = vpop.permute.xlu1 %2805 }
 0x284   :  { %v2808_v52 = vunpack.i.h.bf16 %v2806_v51  ;;  %v2807_v53 = vunpack.i.l.bf16 %v2806_v51  ;;  %252 = vrot.lane.b32.xlu0 %v3122_v50, %s2973_s27  ;;  %302 = vrot.lane.b32.xlu1 %v3120_v49, %s2973_s27 }
 0x286   :  { %v3128_v54 = vpack.c.bf16 %v2808_v52, %v2807_v53 }
 0x287   :  { %v202_v55 = vpop.permute.xlu1 %201 }
 0x288   :  { %v208_v56 = vsel %vm203_vm2, %v202_v55, 0  ;;  %352 = vrot.lane.b32.xlu0 %v3128_v54, %s2973_s27 }
 0x289   :  { %2576 = vmatpush3.bf16.xpose.msra.mxu1 %v208_v56 }
 0x28a   :  { %2587 = vmatprep.subr.bf16.mxu1 %v2968_v15 }
 0x290   :  { %2578 = vmatmul.mubr.msk.bf16.vlgmr.msra.gmra.mxu1 %vm203_vm2, %v3116_v42 }
 0x291   :  { %2589 = vmatprep.mubr.msk.bf16.mxu1 %vm2969_vm1, %v2968_v15 }
 0x2f6   :  { %v253_v57 = vpop.permute.xlu0 %252  ;;  %v303_v58 = vpop.permute.xlu1 %302 }
 0x2f7   :  { %v308_v59 = vsel %vm203_vm2, %v303_v58, 0  ;;  %v258_v60 = vsel %vm203_vm2, %v253_v57, 0 }
 0x2f8   :  { %2582 = vmatpush3.bf16.xpose.msra.mxu0 %v258_v60  ;;  %2588 = vmatpush3.bf16.xpose.msra.mxu1 %v308_v59 }
 0x2f9   :  { %2593 = vmatprep.subr.bf16.mxu0 %v2968_v15  ;;  %2599 = vmatprep.subr.bf16.mxu1 %v2968_v15 }
 0x2fa   :  { %v353_v61 = vpop.permute.xlu0 %352 }
 0x2fb   :  { %v358_v62 = vsel %vm203_vm2, %v353_v61, 0 }
 0x2ff   :  { %2584 = vmatmul.mubr.msk.bf16.vlgmr.msra.gmra.mxu0 %vm203_vm2, %v3122_v50  ;;  %2590 = vmatmul.mubr.msk.bf16.vlgmr.msra.gmra.mxu1 %vm203_vm2, %v3120_v49 }
 0x300   :  { %2594 = vmatpush3.bf16.xpose.msra.mxu0 %v358_v62  ;;  %2595 = vmatprep.mubr.msk.bf16.mxu0 %vm2969_vm1, %v2968_v15 }
 0x301   :  { %2601 = vmatprep.mubr.msk.bf16.mxu1 %vm2969_vm1, %v2968_v15  ;;  %2605 = vmatprep.subr.bf16.mxu0 %v2968_v15 }
 0x307   :  { %2596 = vmatmul.mubr.msk.bf16.vlgmr.msra.gmra.mxu0 %vm203_vm2, %v3128_v54 }
 0x308   :  { %2607 = vmatprep.mubr.msk.bf16.mxu0 %vm2969_vm1, %v2968_v15 }
 0x350   :  { %v244_v2 = vpop.f32.mrf.mxu1 }
 0x351   :  { %v245_v3 = vadd.f32 %v244_v2, %v3159_v63 }
 0x352   :  { %v2579_v4 = vpop.f32.mrf.mxu1 }
 0x353   :  { %v402_v6 = vsel %vm401_vm3, %v245_v3, -inf }
 0x354   :  { %403 = vmax.xlane.f32.xlu1 %v402_v6  ;;  %v247_v7 = vpop.f32.mrf.mxu1 }
 0x355   :  { %v248_v8 = vadd.f32 %v247_v7, %v3165_v5 }
 0x356   :  { %v2580_v9 = vpop.f32.mrf.mxu1 }
 0x357   :  { %v405_v10 = vsel %vm401_vm3, %v248_v8, -inf }
 0x358   :  { %406 = vmax.xlane.f32.xlu0 %v405_v10 }
 0x3bf   :  { %v294_v11 = vpop.f32.mrf.mxu0  ;;  %v344_v12 = vpop.f32.mrf.mxu1 }
 0x3c0   :  { %v295_v13 = vadd.f32 %v294_v11, %v3159_v63  ;;  %v345_v14 = vadd.f32 %v344_v12, %v3159_v63 }
 0x3c1   :  { %v2585_v16 = vpop.f32.mrf.mxu0  ;;  %v2591_v17 = vpop.f32.mrf.mxu1 }
 0x3c2   :  { %v408_v18 = vsel %vm401_vm3, %v295_v13, -inf  ;;  %v414_v19 = vsel %vm401_vm3, %v345_v14, -inf }
 0x3c3   :  { %v297_v20 = vpop.f32.mrf.mxu0  ;;  %409 = vmax.xlane.f32.xlu0 %v408_v18  ;;  %415 = vmax.xlane.f32.xlu1 %v414_v19  ;;  %v347_v21 = vpop.f32.mrf.mxu1 }
 0x3c4   :  { %v298_v22 = vadd.f32 %v297_v20, %v3165_v5  ;;  %v348_v25 = vadd.f32 %v347_v21, %v3165_v5 }
 0x3c5   :  { %v2586_v23 = vpop.f32.mrf.mxu0  ;;  %v2592_v24 = vpop.f32.mrf.mxu1 }
 0x3c6   :  { %v411_v26 = vsel %vm401_vm3, %v298_v22, -inf  ;;  %v417_v31 = vsel %vm401_vm3, %v348_v25, -inf }
 0x3c7   :  { %v394_v27 = vpop.f32.mrf.mxu0  ;;  %412 = vmax.xlane.f32.xlu0 %v411_v26 }
 0x3c8   :  { %v395_v28 = vadd.f32 %v394_v27, %v3159_v63 }
 0x3c9   :  { %v2597_v29 = vpop.f32.mrf.mxu0 }
 0x3ca   :  { %v420_v30 = vsel %vm401_vm3, %v395_v28, -inf }
 0x3cb   :  { %v397_v32 = vpop.f32.mrf.mxu0  ;;  %421 = vmax.xlane.f32.xlu1 %v420_v30  ;;  %418 = vmax.xlane.f32.xlu0 %v417_v31 }
 0x3cc   :  { %v398_v33 = vadd.f32 %v397_v32, %v3165_v5 }
 0x3cd   :  { %v2598_v34 = vpop.f32.mrf.mxu0 }
 0x3ce   :  { %v423_v35 = vsel %vm401_vm3, %v398_v33, -inf }
 0x3cf   :  { %424 = vmax.xlane.f32.xlu0 %v423_v35 }
 0x3dc   :  { %494 = vrot.lane.b32.xlu1 %v3116_v42, %s2974_s19 }
 0x3dd   :  { %v404_v38 = vpop.xlane.xlu1 %403 }
 0x3de   :  { %v426_v40 = vsub.f32 %v245_v3, %v404_v38 }
 0x3e0   :  { %v434_v41 = vmul.f32 1.442695, %v426_v40  ;;  %v686_v40 = vld [vmem:[%s3611_s6] sm:$0xf] }
 0x3e1   :  { %v407_v36 = vpop.xlane.xlu0 %406 }
 0x3e2   :  { %v427_v37 = vsub.f32 %v248_v8, %v407_v36 }
 0x3e4   :  { %v436_v39 = vmul.f32 1.442695, %v427_v37 }
 0x3e6   :  { %2858 = vpow2.f32 %v436_v39 }
 0x3e7   :  { %2860 = vpow2.f32 %v434_v41 }
 0x3f3   :  { %v2859_v43 = vpop.eup %2858 }
 0x3f4   :  { %v453_v44 = vsel %vm401_vm3, %v2859_v43, 0.0  ;;  %v2861_v45 = vpop.eup %2860 }
 0x3f5   :  { %454 = vadd.xlane.f32.xlu0 %v453_v44  ;;  %v450_v46 = vsel %vm401_vm3, %v2861_v45, 0.0 }
 0x400   :  { %451 = vadd.xlane.f32.xlu1 %v450_v46 }
 0x44c   :  { %v410_v47 = vpop.xlane.xlu0 %409  ;;  %v416_v48 = vpop.xlane.xlu1 %415 }
 0x44d   :  { %v428_v51 = vsub.f32 %v295_v13, %v410_v47  ;;  %v430_v42 = vsub.f32 %v345_v14, %v416_v48  ;;  %v695_v47 = vsel %vm693_vm4, %v686_v40, 0 }
 0x44f   :  { %v438_v52 = vmul.f32 1.442695, %v428_v51  ;;  %v442_v53 = vmul.f32 1.442695, %v430_v42 }
 0x450   :  { %v413_v55 = vpop.xlane.xlu0 %412 }
 0x451   :  { %2862 = vpow2.f32 %v438_v52  ;;  %v429_v56 = vsub.f32 %v298_v22, %v413_v55 }
 0x452   :  { %2864 = vpow2.f32 %v442_v53  ;;  %v687_v53 = vld [vmem:[%s3611_s6 + $0x4] sm:$0xf] }
 0x453   :  { %v440_v57 = vmul.f32 1.442695, %v429_v56  ;;  %v742_v55 = vsel %vm693_vm4, %v687_v53, 0 }
 0x454   :  { %v422_v58 = vpop.xlane.xlu1 %421  ;;  %v419_v59 = vpop.xlane.xlu0 %418 }
 0x455   :  { %2866 = vpow2.f32 %v440_v57  ;;  %v432_v60 = vsub.f32 %v395_v28, %v422_v58  ;;  %v431_v61 = vsub.f32 %v348_v25, %v419_v59  ;;  %v688_v58 = vld [vmem:[%s3611_s6 + $0x8] sm:$0xf] }
 0x457   :  { %v446_v62 = vmul.f32 1.442695, %v432_v60  ;;  %v444_v2 = vmul.f32 1.442695, %v431_v61  ;;  %v789_v61 = vsel %vm693_vm4, %v688_v58, 0 }
 0x458   :  { %v495_v3 = vpop.permute.xlu1 %494  ;;  %v425_v4 = vpop.xlane.xlu0 %424 }
 0x459   :  { %2868 = vpow2.f32 %v446_v62  ;;  %v433_v6 = vsub.f32 %v398_v33, %v425_v4  ;;  %2600 = vmatpush3.bf16.msra.mxu1 %v495_v3  ;;  %v689_v4 = vld [vmem:[%s3611_s6 + $0xc] sm:$0xf] }
 0x45a   :  { %2870 = vpow2.f32 %v444_v2  ;;  %2611 = vmatprep.subr.bf16.mxu1 %v2968_v15 }
 0x45b   :  { %v448_v7 = vmul.f32 1.442695, %v433_v6 }
 0x45d   :  { %2872 = vpow2.f32 %v448_v7 }
 0x45e   :  { %v2863_v8 = vpop.eup %2862 }
 0x45f   :  { %v456_v9 = vsel %vm401_vm3, %v2863_v8, 0.0  ;;  %v2865_v10 = vpop.eup %2864 }
 0x460   :  { %457 = vadd.xlane.f32.xlu1 %v456_v9  ;;  %v462_v12 = vsel %vm401_vm3, %v2865_v10, 0.0  ;;  %v836_v9 = vsel %vm693_vm4, %v689_v4, 0 }
 0x462   :  { %v2867_v11 = vpop.eup %2866 }
 0x463   :  { %v459_v13 = vsel %vm401_vm3, %v2867_v11, 0.0 }
 0x464   :  { %463 = vadd.xlane.f32.xlu1 %v462_v12  ;;  %460 = vadd.xlane.f32.xlu0 %v459_v13 }
 0x466   :  { %v2869_v14 = vpop.eup %2868 }
 0x467   :  { %v2871_v16 = vpop.eup %2870  ;;  %v468_v17 = vsel %vm401_vm3, %v2869_v14, 0.0 }
 0x468   :  { %469 = vadd.xlane.f32.xlu1 %v468_v17  ;;  %v465_v18 = vsel %vm401_vm3, %v2871_v16, 0.0 }
 0x469   :  { %466 = vadd.xlane.f32.xlu0 %v465_v18 }
 0x46a   :  { %v2873_v19 = vpop.eup %2872 }
 0x46b   :  { %v471_v20 = vsel %vm401_vm3, %v2873_v19, 0.0 }
 0x46d   :  { %472 = vadd.xlane.f32.xlu0 %v471_v20 }
 0x479   :  { %588 = vrot.lane.b32.xlu1 %v3120_v49, %s2974_s19 }
 0x47d   :  { %635 = vrot.lane.b32.xlu1 %v3128_v54, %s2974_s19 }
 0x47e   :  { %v455_v21 = vpop.xlane.xlu0 %454 }
 0x47f   :  { %2874 = vrcp.f32 %v455_v21 }
 0x483   :  { %541 = vrot.lane.b32.xlu0 %v3122_v50, %s2974_s19 }
 0x489   :  { %v452_v22 = vpop.xlane.xlu1 %451 }
 0x48a   :  { %2876 = vrcp.f32 %v452_v22 }
 0x48c   :  { %v2875_v23 = vpop.eup %2874 }
 0x48d   :  { %v483_v26 = vmul.f32 %v2875_v23, %v2859_v43 }
 0x497   :  { %v2877_v24 = vpop.eup %2876 }
 0x498   :  { %v482_v25 = vmul.f32 %v2877_v24, %v2861_v45 }
 0x49a   :  { %v490_v27 = vpack.c.bf16 %v483_v26, %v482_v25 }
 0x49c   :  { %2602 = vmatmul.mubr.msk.bf16.vlgmr.msra.gmra.mxu1 %vm401_vm3, %v490_v27 }
 0x49d   :  { %2613 = vmatprep.mubr.msk.bf16.mxu1 %vm2969_vm1, %v2968_v15 }
 0x4e9   :  { %v458_v49 = vpop.xlane.xlu1 %457 }
 0x4ea   :  { %2878 = vrcp.f32 %v458_v49 }
 0x4ed   :  { %v464_v54 = vpop.xlane.xlu1 %463  ;;  %v461_v28 = vpop.xlane.xlu0 %460 }
 0x4ee   :  { %2880 = vrcp.f32 %v461_v28 }
 0x4ef   :  { %2882 = vrcp.f32 %v464_v54 }
 0x4f1   :  { %v470_v50 = vpop.xlane.xlu1 %469 }
 0x4f2   :  { %v467_v29 = vpop.xlane.xlu0 %466 }
 0x4f3   :  { %2884 = vrcp.f32 %v467_v29 }
 0x4f4   :  { %2886 = vrcp.f32 %v470_v50 }
 0x4f5   :  { %v589_v30 = vpop.permute.xlu1 %588 }
 0x4f6   :  { %v473_v31 = vpop.xlane.xlu0 %472  ;;  %2612 = vmatpush3.bf16.msra.mxu1 %v589_v30 }
 0x4f7   :  { %2888 = vrcp.f32 %v473_v31  ;;  %2623 = vmatprep.subr.bf16.mxu1 %v2968_v15  ;;  %v2879_v32 = vpop.eup %2878 }
 0x4f8   :  { %v484_v35 = vmul.f32 %v2879_v32, %v2863_v8 }
 0x4f9   :  { %v636_v41 = vpop.permute.xlu1 %635 }
 0x4fa   :  { %v542_v33 = vpop.permute.xlu0 %541 }
 0x4fb   :  { %2606 = vmatpush3.bf16.msra.mxu0 %v542_v33  ;;  %v2881_v34 = vpop.eup %2880 }
 0x4fc   :  { %2617 = vmatprep.subr.bf16.mxu0 %v2968_v15  ;;  %v485_v36 = vmul.f32 %v2881_v34, %v2867_v11  ;;  %v2883_v37 = vpop.eup %2882 }
 0x4fd   :  { %v486_v43 = vmul.f32 %v2883_v37, %v2865_v10 }
 0x4fe   :  { %v491_v38 = vpack.c.bf16 %v485_v36, %v484_v35 }
 0x500   :  { %v2885_v39 = vpop.eup %2884  ;;  %2608 = vmatmul.mubr.msk.bf16.vlgmr.msra.gmra.mxu0 %vm401_vm3, %v491_v38 }
 0x501   :  { %v487_v44 = vmul.f32 %v2885_v39, %v2871_v16  ;;  %v2887_v45 = vpop.eup %2886  ;;  %2618 = vmatpush3.bf16.msra.mxu0 %v636_v41  ;;  %2619 = vmatprep.mubr.msk.bf16.mxu0 %vm2969_vm1, %v2968_v15 }
 0x502   :  { %2629 = vmatprep.subr.bf16.mxu0 %v2968_v15  ;;  %v488_v51 = vmul.f32 %v2887_v45, %v2869_v14 }
 0x503   :  { %v492_v46 = vpack.c.bf16 %v487_v44, %v486_v43  ;;  %v2396_v44 = vld [vmem:[%s3612_s7] ss:$0 sm:$0xff] }
 0x504   :  { %v2889_v48 = vpop.eup %2888 }
 0x505   :  { %2614 = vmatmul.mubr.msk.bf16.vlgmr.msra.gmra.mxu1 %vm401_vm3, %v492_v46  ;;  %v489_v42 = vmul.f32 %v2889_v48, %v2873_v19 }
 0x506   :  { %2624 = vmatpush3.bf16.msra.mxu1 %v695_v47  ;;  %2625 = vmatprep.mubr.msk.bf16.mxu1 %vm2969_vm1, %v2968_v15 }
 0x507   :  { %v493_v52 = vpack.c.bf16 %v489_v42, %v488_v51  ;;  %2635 = vmatprep.subr.bf16.mxu1 %v2968_v15 }
 0x509   :  { %2620 = vmatmul.mubr.msk.bf16.vlgmr.msra.gmra.mxu0 %vm401_vm3, %v493_v52 }
 0x50a   :  { %2631 = vmatprep.mubr.msk.bf16.mxu0 %vm2969_vm1, %v2968_v15  ;;  %2630 = vmatpush3.bf16.msra.mxu0 %v742_v55 }
 0x50b   :  { %2641 = vmatprep.subr.bf16.mxu0 %v2968_v15 }
 0x55c   :  { %v534_v56 = vpop.f32.mrf.mxu1 }
 0x55e   :  { %v2603_v57 = vpop.f32.mrf.mxu1 }
 0x560   :  { %v537_v59 = vpop.f32.mrf.mxu1 }
 0x561   :  { %v682_v60 = vpack.c.bf16 %v537_v59, %v534_v56 }
 0x562   :  { %v2604_v62 = vpop.f32.mrf.mxu1 }
 0x563   :  { %2626 = vmatmul.mubr.msk.bf16.vlgmr.msra.gmra.mxu1 %vm203_vm2, %v682_v60 }
 0x564   :  { %2636 = vmatpush3.bf16.msra.mxu1 %v789_v61  ;;  %2637 = vmatprep.mubr.msk.bf16.mxu1 %vm2969_vm1, %v2968_v15 }
 0x565   :  { %2647 = vmatprep.subr.bf16.mxu1 %v2968_v15 }
 0x5c0   :  { %v581_v2 = vpop.f32.mrf.mxu0 }
 0x5c2   :  { %v2609_v3 = vpop.f32.mrf.mxu0 }
 0x5c4   :  { %v584_v6 = vpop.f32.mrf.mxu0 }
 0x5c5   :  { %v628_v7 = vpop.f32.mrf.mxu1  ;;  %v683_v8 = vpack.c.bf16 %v584_v6, %v581_v2  ;;  %v2826_v6 = vld [vmem:[%s3615_s10 + $0x8] sm:$0xff]  }
 0x5c6   :  { %v2610_v10 = vpop.f32.mrf.mxu0 }
 0x5c7   :  { %v2615_v11 = vpop.f32.mrf.mxu1  ;;  %2632 = vmatmul.mubr.msk.bf16.vlgmr.msra.gmra.mxu0 %vm203_vm2, %v683_v8 }
 0x5c8   :  { %2642 = vmatpush3.bf16.msra.mxu0 %v836_v9  ;;  %2643 = vmatprep.mubr.msk.bf16.mxu0 %vm2969_vm1, %v2968_v15 }
 0x5c9   :  { %v631_v12 = vpop.f32.mrf.mxu1  ;;  %v675_v13 = vpop.f32.mrf.mxu0  ;;  %2655 = vmatprep.subr.bf16.mxu0 %v2968_v15 }
 0x5ca   :  { %v684_v14 = vpack.c.bf16 %v631_v12, %v628_v7  ;;  %v2827_v7 = vld [vmem:[%s3615_s10] sm:$0xff]  }
 0x5cb   :  { %v2616_v16 = vpop.f32.mrf.mxu1  ;;  %v2621_v17 = vpop.f32.mrf.mxu0 }
 0x5cc   :  { %2638 = vmatmul.mubr.msk.bf16.vlgmr.msra.gmra.mxu1 %vm203_vm2, %v684_v14  ;;  %v2397_v17 = vld [vmem:[%s3613_s8] ss:$0 sm:$0xff] }
 0x5cd   :  { %v678_v18 = vpop.f32.mrf.mxu0  ;;  %2651 = vmatprep.mubr.msk.bf16.mxu1 %vm2969_vm1, %v2968_v15  ;;  %2648 = vmatpush3.bf16.msra.mxu1 %v2826_v6 }
 0x5ce   :  { %v685_v19 = vpack.c.bf16 %v678_v18, %v675_v13  ;;  %2649 = vmatprep.subr.bf16.mxu1 %v2968_v15 }
 0x5cf   :  { %v2622_v20 = vpop.f32.mrf.mxu0 }
 0x5d0   :  { %2644 = vmatmul.mubr.msk.bf16.vlgmr.msra.gmra.mxu0 %vm203_vm2, %v685_v19 }
 0x5d1   :  { %2671 = vmatprep.mubr.msk.bf16.mxu0 %vm2969_vm1, %v2968_v15  ;;  %2650 = vmatpush3.bf16.msra.mxu1 %v2827_v7 }
 0x5d2   :  { %2675 = vmatprep.subr.bf16.mxu1 %v2968_v15 }
 0x623   :  { %v731_v21 = vpop.f32.mrf.mxu1 }
 0x624   :  { %v879_v28 = vsel %vm64_vm0, %v731_v21, 0.0  ;;  %v2398_v21 = vld [vmem:[%s3614_s9] ss:$0 sm:$0xff] }
 0x625   :  { %v2627_v22 = vpop.f32.mrf.mxu1 }
 0x627   :  { %v734_v23 = vpop.f32.mrf.mxu1 }
 0x628   :  { %v886_v36 = vsel %vm64_vm0, %v734_v23, 0.0 }
 0x629   :  { %v2628_v24 = vpop.f32.mrf.mxu1 }
 0x687   :  { %v778_v25 = vpop.f32.mrf.mxu0 }
 0x688   :  { %v880_v27 = vsel %vm64_vm0, %v778_v25, 0.0 }
 0x689   :  { %v2633_v26 = vpop.f32.mrf.mxu0  ;;  %v881_v29 = vadd.f32 %v880_v27, %v879_v28  ;;  %v2829_v27 = vld [vmem:[%s3617_s12 + $0x30] sm:$0xff]   ;;  %v2832_v28 = vld [vmem:[%s3617_s12 + $0x18] sm:$0xff]  }
 0x68a   :  { %v2828_v26 = vld [vmem:[%s3617_s12 + $0x38] sm:$0xff]  }
 0x68b   :  { %v781_v49 = vpop.f32.mrf.mxu0  ;;  %2656 = vmatpush3.bf16.msra.mxu0 %v2828_v26 }
 0x68c   :  { %v825_v54 = vpop.f32.mrf.mxu1  ;;  %v887_v32 = vsel %vm64_vm0, %v781_v49, 0.0  ;;  %2657 = vmatprep.subr.bf16.mxu0 %v2968_v15  ;;  %v2830_v49 = vld [vmem:[%s3617_s12 + $0x28] sm:$0xff]  }
 0x68d   :  { %v882_v50 = vsel %vm64_vm0, %v825_v54, 0.0  ;;  %v2634_v30 = vpop.f32.mrf.mxu0  ;;  %v888_v39 = vadd.f32 %v887_v32, %v886_v36  ;;  %v2831_v54 = vld [vmem:[%s3617_s12 + $0x20] sm:$0xff]  }
 0x68e   :  { %v2639_v31 = vpop.f32.mrf.mxu1  ;;  %v883_v33 = vadd.f32 %v882_v50, %v881_v29  ;;  %v2833_v50 = vld [vmem:[%s3617_s12 + $0x10] sm:$0xff]   ;;  %v2834_v29 = vld [vmem:[%s3617_s12 + $0x8] sm:$0xff]   ;;  %v2835_v30 = vld [vmem:[%s3617_s12] sm:$0xff]  }
 0x68f   :  { %2658 = vmatpush3.bf16.msra.mxu0 %v2829_v27  ;;  %v2399_v31 = vld [vmem:[%s3616_s11] ss:$0 sm:$0xff] }
 0x690   :  { %v828_v34 = vpop.f32.mrf.mxu1  ;;  %v872_v35 = vpop.f32.mrf.mxu0  ;;  %2659 = vmatprep.subr.bf16.mxu0 %v2968_v15 }
 0x691   :  { %v889_v37 = vsel %vm64_vm0, %v828_v34, 0.0  ;;  %v884_v38 = vsel %vm64_vm0, %v872_v35, 0.0 }
 0x692   :  { %v885_v40 = vadd.f32 %v884_v38, %v883_v33  ;;  %v2640_v41 = vpop.f32.mrf.mxu1  ;;  %v2645_v43 = vpop.f32.mrf.mxu0  ;;  %v890_v45 = vadd.f32 %v889_v37, %v888_v39 }
 0x693   :  { %2660 = vmatpush3.bf16.msra.mxu0 %v2830_v49 }
 0x694   :  { %v893_v46 = vadd.f32 %v885_v40, %v3072_v0  ;;  %v875_v47 = vpop.f32.mrf.mxu0  ;;  %2661 = vmatprep.subr.bf16.mxu0 %v2968_v15 }
 0x695   :  { %v891_v48 = vsel %vm64_vm0, %v875_v47, 0.0 }
 0x696   :  { %v892_v51 = vadd.f32 %v891_v48, %v890_v45  ;;  %v2646_v42 = vpop.f32.mrf.mxu0  ;;  %v3258_v52 = vadd.f32 %v2396_v44, %v893_v46 }
 0x697   :  { %2662 = vmatpush3.bf16.msra.mxu0 %v2831_v54 }
 0x698   :  { %v894_v53 = vadd.f32 %v892_v51, %v3077_v1  ;;  %v906_v55 = vsel %vm64_vm0, %v3258_v52, 0.0  ;;  %2663 = vmatprep.subr.bf16.mxu0 %v2968_v15 }
 0x699   :  { %907 = vadd.xlane.f32.xlu1 %v906_v55 }
 0x69a   :  { %v3263_v56 = vadd.f32 %v2396_v44, %v894_v53 }
 0x69b   :  { %2664 = vmatpush3.bf16.msra.mxu0 %v2832_v28  ;;  %v2414_v28 = vld [vmem:[%s3607_s2 + $0x1] ss:$0 sm:$0xff] }
 0x69c   :  { %v909_v57 = vsel %vm64_vm0, %v3263_v56, 0.0  ;;  %2665 = vmatprep.subr.bf16.mxu0 %v2968_v15 }
 0x69d   :  { %910 = vadd.xlane.f32.xlu0 %v909_v57 }
 0x69f   :  { %2666 = vmatpush3.bf16.msra.mxu0 %v2833_v50 }
 0x6a0   :  { %2667 = vmatprep.subr.bf16.mxu0 %v2968_v15 }
 0x6a3   :  { %2668 = vmatpush3.bf16.msra.mxu0 %v2834_v29 }
 0x6a4   :  { %2669 = vmatprep.subr.bf16.mxu0 %v2968_v15 }
 0x6a7   :  { %2670 = vmatpush3.bf16.msra.mxu0 %v2835_v30 }
 0x6a8   :  { %2701 = vmatprep.subr.bf16.mxu0 %v2968_v15 }
 0x722   :  { %v908_v0 = vpop.xlane.xlu1 %907 }
 0x723   :  { %v912_v58 = vmul.f32 0.03125, %v908_v0 }
 0x725   :  { %v914_v59 = vsub.f32 %v3258_v52, %v912_v58 }
 0x726   :  { %v911_v60 = vpop.xlane.xlu0 %910 }
 0x727   :  { %v913_v61 = vmul.f32 0.03125, %v911_v60  ;;  %v916_v62 = vmul.f32 %v914_v59, %v914_v59 }
 0x729   :  { %v915_v2 = vsub.f32 %v3263_v56, %v913_v61  ;;  %v918_v1 = vsel %vm64_vm0, %v916_v62, 0.0  ;;  %v2403_v61 = vld [vmem:[%s3618_s13] ss:$0 sm:$0xff] }
 0x72a   :  { %919 = vadd.xlane.f32.xlu0 %v918_v1 }
 0x72b   :  { %v917_v3 = vmul.f32 %v915_v2, %v915_v2 }
 0x72d   :  { %v921_v4 = vsel %vm64_vm0, %v917_v3, 0.0 }
 0x72e   :  { %922 = vadd.xlane.f32.xlu0 %v921_v4 }
 0x7b3   :  { %v920_v8 = vpop.xlane.xlu0 %919 }
 0x7b4   :  { %v924_v9 = vmul.f32 0.03125, %v920_v8 }
 0x7b6   :  { %v926_v10 = vadd.f32 1e-05, %v924_v9 }
 0x7b7   :  { %v923_v11 = vpop.xlane.xlu0 %922 }
 0x7b8   :  { %2890 = vrsqrt.f32 %v926_v10  ;;  %v925_v12 = vmul.f32 0.03125, %v923_v11 }
 0x7ba   :  { %v927_v13 = vadd.f32 1e-05, %v925_v12 }
 0x7bc   :  { %2892 = vrsqrt.f32 %v927_v13 }
 0x7c5   :  { %v2891_v14 = vpop.eup %2890 }
 0x7c6   :  { %v930_v16 = vmul.f32 %v2891_v14, %v914_v59 }
 0x7c8   :  { %v938_v20 = vmul.f32 %v2397_v17, %v930_v16 }
 0x7c9   :  { %v2893_v18 = vpop.eup %2892 }
 0x7ca   :  { %v931_v19 = vmul.f32 %v2893_v18, %v915_v2  ;;  %v946_v23 = vadd.f32 %v2398_v21, %v938_v20  ;;  %v2836_v20 = vld [vmem:[%s3609_s4 + $0x18] sm:$0xff]  }
 0x7cc   :  { %v939_v22 = vmul.f32 %v2397_v17, %v931_v19 }
 0x7ce   :  { %v947_v24 = vadd.f32 %v2398_v21, %v939_v22  ;;  %v2837_v21 = vld [vmem:[%s3609_s4 + $0x10] sm:$0xff]  }
 0x7d0   :  { %v948_v25 = vpack.c.bf16 %v947_v24, %v946_v23 }
 0x7d2   :  { %2652 = vmatmul.mubr.msk.bf16.vlgmr.msra.gmra.mxu1 %vm64_vm0, %v948_v25 }
 0x7d3   :  { %2679 = vmatprep.mubr.msk.bf16.mxu1 %vm2969_vm1, %v2968_v15  ;;  %2676 = vmatpush3.bf16.msra.mxu1 %v2836_v20 }
 0x7d4   :  { %2677 = vmatprep.subr.bf16.mxu1 %v2968_v15 }
 0x7d7   :  { %2678 = vmatpush3.bf16.msra.mxu1 %v2837_v21 }
 0x7d8   :  { %2683 = vmatprep.subr.bf16.mxu1 %v2968_v15 }
 0x892   :  { %v1009_v32 = vpop.f32.mrf.mxu1 }
 0x893   :  { %v1010_v33 = vadd.f32 %v2399_v31, %v1009_v32 }
 0x894   :  { %v2653_v34 = vpop.f32.mrf.mxu1 }
 0x895   :  { %v1018_v35 = vmul.f32 0.044715, %v1010_v33  ;;  %v1016_v55 = vmul.f32 0.5, %v1010_v33 }
 0x896   :  { %v1012_v36 = vpop.f32.mrf.mxu1 }
 0x897   :  { %v1020_v37 = vmul.f32 %v1018_v35, %v1010_v33  ;;  %v1013_v38 = vadd.f32 %v2399_v31, %v1012_v36  ;;  %v2415_v31 = vld [vmem:[%s3608_s3 + $0x1] ss:$0 sm:$0xff] }
 0x898   :  { %v2654_v39 = vpop.f32.mrf.mxu1 }
 0x899   :  { %v1022_v40 = vmul.f32 %v1020_v37, %v1010_v33  ;;  %v1019_v41 = vmul.f32 0.044715, %v1013_v38  ;;  %v1017_v57 = vmul.f32 0.5, %v1013_v38  ;;  %v2421_v37 = vld [vmem:[%s3610_s5 + $0x1] ss:$0 sm:$0xff] }
 0x89b   :  { %v1024_v43 = vadd.f32 %v1022_v40, %v1010_v33  ;;  %v1021_v44 = vmul.f32 %v1019_v41, %v1013_v38 }
 0x89d   :  { %v1026_v45 = vmul.f32 0.7978846, %v1024_v43  ;;  %v1023_v46 = vmul.f32 %v1021_v44, %v1013_v38 }
 0x89f   :  { %2894 = vtanh.f32 %v1026_v45  ;;  %v1025_v47 = vadd.f32 %v1023_v46, %v1013_v38 }
 0x8a1   :  { %v1027_v48 = vmul.f32 0.7978846, %v1025_v47 }
 0x8a3   :  { %2896 = vtanh.f32 %v1027_v48 }
 0x8ac   :  { %v2895_v51 = vpop.eup %2894 }
 0x8ad   :  { %v1030_v42 = vadd.f32 1.0, %v2895_v51 }
 0x8af   :  { %v1032_v58 = vmul.f32 %v1030_v42, %v1016_v55 }
 0x8b0   :  { %v2897_v53 = vpop.eup %2896 }
 0x8b1   :  { %v1031_v0 = vadd.f32 1.0, %v2897_v53 }
 0x8b3   :  { %v1033_v59 = vmul.f32 %v1031_v0, %v1017_v57 }
 0x8b5   :  { %v1034_v60 = vpack.c.bf16 %v1033_v59, %v1032_v58 }
 0x8b7   :  { %2672 = vmatmul.mubr.bf16.vlgmr.msra.gmra.mxu0 %v1034_v60 }
 0x8b8   :  { %2703 = vmatprep.mubr.msk.bf16.mxu0 %vm2969_vm1, %v2968_v15 }
 0x977   :  { %v1140_v62 = vpop.f32.mrf.mxu0 }
 0x978   :  { %v1141_v2 = vadd.f32 %v2403_v61, %v1140_v62 }
 0x979   :  { %v2673_v1 = vpop.f32.mrf.mxu0 }
 0x97a   :  { %v3329_v3 = vadd.f32 %v1141_v2, %v3258_v52 }
 0x97b   :  { %v1143_v4 = vpop.f32.mrf.mxu0 }
 0x97c   :  { %v1144_v6 = vadd.f32 %v2403_v61, %v1143_v4  ;;  %v1153_v7 = vsel %vm64_vm0, %v3329_v3, 0.0 }
 0x97d   :  { %1154 = vadd.xlane.f32.xlu1 %v1153_v7  ;;  %v2674_v8 = vpop.f32.mrf.mxu0 }
 0x97e   :  { %v3334_v9 = vadd.f32 %v1144_v6, %v3263_v56 }
 0x980   :  { %v1156_v10 = vsel %vm64_vm0, %v3334_v9, 0.0 }
 0x981   :  { %1157 = vadd.xlane.f32.xlu0 %v1156_v10 }
 0xa06   :  { %v1155_v11 = vpop.xlane.xlu1 %1154 }
 0xa07   :  { %v1159_v12 = vmul.f32 0.03125, %v1155_v11 }
 0xa09   :  { %v1161_v13 = vsub.f32 %v3329_v3, %v1159_v12 }
 0xa0a   :  { %v1158_v52 = vpop.xlane.xlu0 %1157 }
 0xa0b   :  { %v1160_v14 = vmul.f32 0.03125, %v1158_v52  ;;  %v1163_v16 = vmul.f32 %v1161_v13, %v1161_v13 }
 0xa0d   :  { %v1162_v17 = vsub.f32 %v3334_v9, %v1160_v14  ;;  %v1165_v18 = vsel %vm64_vm0, %v1163_v16, 0.0 }
 0xa0e   :  { %1166 = vadd.xlane.f32.xlu1 %v1165_v18 }
 0xa0f   :  { %v1164_v19 = vmul.f32 %v1162_v17, %v1162_v17 }
 0xa11   :  { %v1168_v56 = vsel %vm64_vm0, %v1164_v19, 0.0 }
 0xa12   :  { %1169 = vadd.xlane.f32.xlu0 %v1168_v56 }
 0xa97   :  { %v1167_v22 = vpop.xlane.xlu1 %1166 }
 0xa98   :  { %v1171_v23 = vmul.f32 0.03125, %v1167_v22 }
 0xa9a   :  { %v1173_v24 = vadd.f32 1e-05, %v1171_v23 }
 0xa9b   :  { %v1170_v25 = vpop.xlane.xlu0 %1169 }
 0xa9c   :  { %2898 = vrsqrt.f32 %v1173_v24  ;;  %v1172_v26 = vmul.f32 0.03125, %v1170_v25 }
 0xa9e   :  { %v1174_v27 = vadd.f32 1e-05, %v1172_v26 }
 0xaa0   :  { %2900 = vrsqrt.f32 %v1174_v27 }
 0xaa9   :  { %v2899_v49 = vpop.eup %2898 }
 0xaaa   :  { %v1177_v54 = vmul.f32 %v2899_v49, %v1161_v13 }
 0xaac   :  { %v1185_v30 = vmul.f32 %v2414_v28, %v1177_v54 }
 0xaad   :  { %v2901_v50 = vpop.eup %2900 }
 0xaae   :  { %v1178_v29 = vmul.f32 %v2901_v50, %v1162_v17  ;;  %v1193_v33 = vadd.f32 %v2415_v31, %v1185_v30 }
 0xab0   :  { %v1186_v32 = vmul.f32 %v2414_v28, %v1178_v29 }
 0xab2   :  { %v1194_v34 = vadd.f32 %v2415_v31, %v1186_v32 }
 0xab4   :  { %v1195_v35 = vpack.c.bf16 %v1194_v34, %v1193_v33 }
 0xab6   :  { %2680 = vmatmul.mubr.msk.bf16.vlgmr.msra.gmra.mxu1 %vm64_vm0, %v1195_v35 }
 0xab7   :  { %2685 = vmatprep.mubr.msk.bf16.mxu1 %vm2969_vm1, %v2968_v15 }
 0xb76   :  { %v1258_v36 = vpop.f32.mrf.mxu1 }
 0xb77   :  { %v1259_v40 = vadd.f32 %v2421_v37, %v1258_v36 }
 0xb78   :  { %v2681_v38 = vpop.f32.mrf.mxu1 }
 0xb7a   :  { %v1261_v39 = vpop.f32.mrf.mxu1 }
 0xb7b   :  { %v1262_v41 = vadd.f32 %v2421_v37, %v1261_v39 }
 0xb7c   :  { %v2682_v43 = vpop.f32.mrf.mxu1 }
 0xb7d   :  { %v2814_v44 = vpack.i.bf16 %v1262_v41, %v1259_v40  ;;  %v3365_v45 = vpack.c.bf16 %v1262_v41, %v1259_v40 }
 0xb7f   :  { %2815 = vrot.lane.b32.xlu0 %v2814_v44, %s2970_s24  ;;  %2810 = vrot.lane.b32.xlu1 %v2814_v44, %s2971_s25 }
 0xb83   :  { %2820 = vrot.lane.b32.xlu1 %v2814_v44, %s2972_s26 }
 0xb87   :  { %1290 = vrot.lane.b32.xlu1 %v3365_v45, %s2973_s27 }
 0xbf1   :  { %v2816_v46 = vpop.permute.xlu0 %2815  ;;  %v2811_v47 = vpop.permute.xlu1 %2810 }
 0xbf2   :  { %v2818_v48 = vunpack.i.h.bf16 %v2816_v46  ;;  %v2817_v51 = vunpack.i.l.bf16 %v2816_v46  ;;  %v2813_v42 = vunpack.i.h.bf16 %v2811_v47  ;;  %v2812_v53 = vunpack.i.l.bf16 %v2811_v47 }
 0xbf4   :  { %v3369_v55 = vpack.c.bf16 %v2818_v48, %v2817_v51  ;;  %v3371_v57 = vpack.c.bf16 %v2813_v42, %v2812_v53 }
 0xbf5   :  { %v2821_v0 = vpop.permute.xlu1 %2820 }
 0xbf6   :  { %v2823_v58 = vunpack.i.h.bf16 %v2821_v0  ;;  %v2822_v59 = vunpack.i.l.bf16 %v2821_v0  ;;  %1390 = vrot.lane.b32.xlu0 %v3369_v55, %s2973_s27  ;;  %1340 = vrot.lane.b32.xlu1 %v3371_v57, %s2973_s27 }
 0xbf8   :  { %v3377_v60 = vpack.c.bf16 %v2823_v58, %v2822_v59 }
 0xbf9   :  { %v1291_v61 = vpop.permute.xlu1 %1290 }
 0xbfa   :  { %v1296_v62 = vsel %vm203_vm2, %v1291_v61, 0  ;;  %1440 = vrot.lane.b32.xlu1 %v3377_v60, %s2973_s27 }
 0xbfb   :  { %2684 = vmatpush3.bf16.xpose.msra.mxu1 %v1296_v62 }
 0xbfc   :  { %2689 = vmatprep.subr.bf16.mxu1 %v2968_v15 }
 0xc02   :  { %2686 = vmatmul.mubr.msk.bf16.vlgmr.msra.gmra.mxu1 %vm203_vm2, %v3365_v45 }
 0xc03   :  { %2691 = vmatprep.mubr.msk.bf16.mxu1 %vm2969_vm1, %v2968_v15 }
 0xc68   :  { %v1341_v2 = vpop.permute.xlu1 %1340  ;;  %v1391_v7 = vpop.permute.xlu0 %1390 }
 0xc69   :  { %v1346_v1 = vsel %vm203_vm2, %v1341_v2, 0  ;;  %v1396_v8 = vsel %vm203_vm2, %v1391_v7, 0 }
 0xc6a   :  { %2690 = vmatpush3.bf16.xpose.msra.mxu1 %v1346_v1 }
 0xc6b   :  { %2695 = vmatprep.subr.bf16.mxu1 %v2968_v15 }
 0xc6c   :  { %v1441_v4 = vpop.permute.xlu1 %1440 }
 0xc6d   :  { %v1446_v6 = vsel %vm203_vm2, %v1441_v4, 0 }
 0xc6e   :  { %2702 = vmatpush3.bf16.xpose.msra.mxu0 %v1446_v6 }
 0xc6f   :  { %2713 = vmatprep.subr.bf16.mxu0 %v2968_v15 }
 0xc71   :  { %2692 = vmatmul.mubr.msk.bf16.vlgmr.msra.gmra.mxu1 %vm203_vm2, %v3371_v57 }
 0xc72   :  { %2696 = vmatpush3.bf16.xpose.msra.mxu1 %v1396_v8  ;;  %2697 = vmatprep.mubr.msk.bf16.mxu1 %vm2969_vm1, %v2968_v15 }
 0xc73   :  { %2707 = vmatprep.subr.bf16.mxu1 %v2968_v15 }
 0xc75   :  { %2704 = vmatmul.mubr.msk.bf16.vlgmr.msra.gmra.mxu0 %vm203_vm2, %v3377_v60 }
 0xc76   :  { %2715 = vmatprep.mubr.msk.bf16.mxu0 %vm2969_vm1, %v2968_v15 }
 0xc79   :  { %2698 = vmatmul.mubr.msk.bf16.vlgmr.msra.gmra.mxu1 %vm203_vm2, %v3369_v55 }
 0xc7a   :  { %2709 = vmatprep.mubr.msk.bf16.mxu1 %vm2969_vm1, %v2968_v15 }
 0xcc2   :  { %v1332_v10 = vpop.f32.mrf.mxu1 }
 0xcc3   :  { %v1333_v11 = vadd.f32 %v1332_v10, %v3159_v63 }
 0xcc4   :  { %v2687_v12 = vpop.f32.mrf.mxu1 }
 0xcc5   :  { %v1489_v13 = vsel %vm401_vm3, %v1333_v11, -inf }
 0xcc6   :  { %1490 = vmax.xlane.f32.xlu0 %v1489_v13  ;;  %v1335_v52 = vpop.f32.mrf.mxu1 }
 0xcc7   :  { %v1336_v14 = vadd.f32 %v1335_v52, %v3165_v5 }
 0xcc8   :  { %v2688_v16 = vpop.f32.mrf.mxu1 }
 0xcc9   :  { %v1492_v17 = vsel %vm401_vm3, %v1336_v14, -inf }
 0xcca   :  { %1493 = vmax.xlane.f32.xlu1 %v1492_v17 }
 0xd31   :  { %v1382_v18 = vpop.f32.mrf.mxu1 }
 0xd32   :  { %v1383_v19 = vadd.f32 %v1382_v18, %v3159_v63 }
 0xd33   :  { %v2693_v56 = vpop.f32.mrf.mxu1 }
 0xd34   :  { %v1495_v20 = vsel %vm401_vm3, %v1383_v19, -inf }
 0xd35   :  { %v1482_v21 = vpop.f32.mrf.mxu0  ;;  %1496 = vmax.xlane.f32.xlu0 %v1495_v20  ;;  %v1385_v22 = vpop.f32.mrf.mxu1 }
 0xd36   :  { %v1386_v23 = vadd.f32 %v1385_v22, %v3165_v5  ;;  %v1483_v29 = vadd.f32 %v1482_v21, %v3159_v63 }
 0xd37   :  { %v2694_v24 = vpop.f32.mrf.mxu1  ;;  %v2705_v25 = vpop.f32.mrf.mxu0 }
 0xd38   :  { %v1498_v26 = vsel %vm401_vm3, %v1386_v23, -inf  ;;  %v1507_v35 = vsel %vm401_vm3, %v1483_v29, -inf }
 0xd39   :  { %v1485_v27 = vpop.f32.mrf.mxu0  ;;  %1499 = vmax.xlane.f32.xlu0 %v1498_v26  ;;  %v1432_v49 = vpop.f32.mrf.mxu1 }
 0xd3a   :  { %v1433_v54 = vadd.f32 %v1432_v49, %v3159_v63  ;;  %v1486_v34 = vadd.f32 %v1485_v27, %v3165_v5 }
 0xd3b   :  { %v2699_v28 = vpop.f32.mrf.mxu1  ;;  %v2706_v50 = vpop.f32.mrf.mxu0 }
 0xd3c   :  { %v1501_v30 = vsel %vm401_vm3, %v1433_v54, -inf  ;;  %v1510_v37 = vsel %vm401_vm3, %v1486_v34, -inf }
 0xd3d   :  { %1502 = vmax.xlane.f32.xlu0 %v1501_v30  ;;  %v1435_v31 = vpop.f32.mrf.mxu1 }
 0xd3e   :  { %v3417_v32 = vadd.f32 %v1435_v31, %v3165_v5 }
 0xd3f   :  { %v2700_v33 = vpop.f32.mrf.mxu1 }
 0xd40   :  { %v1504_v36 = vsel %vm401_vm3, %v3417_v32, -inf }
 0xd41   :  { %1508 = vmax.xlane.f32.xlu0 %v1507_v35  ;;  %1505 = vmax.xlane.f32.xlu1 %v1504_v36 }
 0xd45   :  { %1511 = vmax.xlane.f32.xlu1 %v1510_v37 }
 0xd4f   :  { %v1491_v63 = vpop.xlane.xlu0 %1490 }
 0xd50   :  { %v1513_v38 = vsub.f32 %v1333_v11, %v1491_v63 }
 0xd52   :  { %v1521_v39 = vmul.f32 1.442695, %v1513_v38 }
 0xd53   :  { %v1494_v40 = vpop.xlane.xlu1 %1493 }
 0xd54   :  { %2902 = vpow2.f32 %v1521_v39  ;;  %v1514_v41 = vsub.f32 %v1336_v14, %v1494_v40 }
 0xd56   :  { %v1523_v43 = vmul.f32 1.442695, %v1514_v41 }
 0xd58   :  { %2904 = vpow2.f32 %v1523_v43 }
 0xd61   :  { %v3424_v44 = vpop.eup %2902 }
 0xd62   :  { %v1537_v5 = vsel %vm401_vm3, %v3424_v44, 0.0 }
 0xd63   :  { %1538 = vadd.xlane.f32.xlu0 %v1537_v5 }
 0xd65   :  { %v3428_v46 = vpop.eup %2904 }
 0xd66   :  { %v1540_v47 = vsel %vm401_vm3, %v3428_v46, 0.0 }
 0xd67   :  { %1541 = vadd.xlane.f32.xlu1 %v1540_v47 }
 0xdbe   :  { %v1497_v48 = vpop.xlane.xlu0 %1496 }
 0xdbf   :  { %v1515_v51 = vsub.f32 %v1383_v19, %v1497_v48 }
 0xdc1   :  { %v1525_v42 = vmul.f32 1.442695, %v1515_v51  ;;  %v2433_v51 = vld [vmem:[%s3611_s6 + $0x10] sm:$0xf] }
 0xdc2   :  { %v1500_v53 = vpop.xlane.xlu0 %1499 }
 0xdc3   :  { %2906 = vpow2.f32 %v1525_v42  ;;  %v1516_v0 = vsub.f32 %v1386_v23, %v1500_v53  ;;  %v2434_v42 = vld [vmem:[%s3611_s6 + $0x14] sm:$0xf]  ;;  %v1782_v53 = vsel %vm693_vm4, %v2433_v51, 0 }
 0xdc5   :  { %v1527_v58 = vmul.f32 1.442695, %v1516_v0  ;;  %v1829_v0 = vsel %vm693_vm4, %v2434_v42, 0 }
 0xdc6   :  { %v1503_v59 = vpop.xlane.xlu0 %1502 }
 0xdc7   :  { %2908 = vpow2.f32 %v1527_v58  ;;  %v1517_v61 = vsub.f32 %v1433_v54, %v1503_v59 }
 0xdc9   :  { %v1529_v4 = vmul.f32 1.442695, %v1517_v61 }
 0xdca   :  { %v1509_v62 = vpop.xlane.xlu0 %1508  ;;  %v1506_v2 = vpop.xlane.xlu1 %1505 }
 0xdcb   :  { %v1519_v1 = vsub.f32 %v1483_v29, %v1509_v62  ;;  %v1518_v20 = vsub.f32 %v3417_v32, %v1506_v2  ;;  %v2436_v2 = vld [vmem:[%s3611_s6 + $0x1c] sm:$0xf] }
 0xdcd   :  { %v1533_v6 = vmul.f32 1.442695, %v1519_v1  ;;  %v1531_v21 = vmul.f32 1.442695, %v1518_v20  ;;  %v2435_v1 = vld [vmem:[%s3611_s6 + $0x18] sm:$0xf] }
 0xdce   :  { %v1512_v7 = vpop.xlane.xlu1 %1511 }
 0xdcf   :  { %2910 = vpow2.f32 %v1533_v6  ;;  %v1520_v8 = vsub.f32 %v1486_v34, %v1512_v7 }
 0xdd0   :  { %v2907_v10 = vpop.eup %2906  ;;  %2912 = vpow2.f32 %v1529_v4 }
 0xdd1   :  { %v1535_v11 = vmul.f32 1.442695, %v1520_v8  ;;  %v1543_v12 = vsel %vm401_vm3, %v2907_v10, 0.0 }
 0xdd2   :  { %1544 = vadd.xlane.f32.xlu0 %v1543_v12 }
 0xdd3   :  { %2914 = vpow2.f32 %v1535_v11 }
 0xdd4   :  { %v2909_v13 = vpop.eup %2908  ;;  %2916 = vpow2.f32 %v1531_v21 }
 0xdd5   :  { %v1546_v52 = vsel %vm401_vm3, %v2909_v13, 0.0 }
 0xdd6   :  { %1547 = vadd.xlane.f32.xlu1 %v1546_v52 }
 0xddc   :  { %v2911_v14 = vpop.eup %2910 }
 0xddd   :  { %v1555_v16 = vsel %vm401_vm3, %v2911_v14, 0.0  ;;  %v3435_v17 = vpop.eup %2912 }
 0xdde   :  { %1556 = vadd.xlane.f32.xlu0 %v1555_v16  ;;  %v1549_v19 = vsel %vm401_vm3, %v3435_v17, 0.0 }
 0xde0   :  { %v2915_v18 = vpop.eup %2914 }
 0xde1   :  { %v1558_v56 = vsel %vm401_vm3, %v2915_v18, 0.0  ;;  %v2917_v22 = vpop.eup %2916 }
 0xde2   :  { %1550 = vadd.xlane.f32.xlu0 %v1549_v19  ;;  %1559 = vadd.xlane.f32.xlu1 %v1558_v56  ;;  %v1552_v23 = vsel %vm401_vm3, %v2917_v22, 0.0 }
 0xdec   :  { %v1539_v24 = vpop.xlane.xlu0 %1538 }
 0xdf0   :  { %v1542_v25 = vpop.xlane.xlu1 %1541 }
 0xdf1   :  { %2918 = vrcp.f32 %v1542_v25 }
 0xdf3   :  { %1628 = vrot.lane.b32.xlu1 %v3371_v57, %s2974_s19 }
 0xdf7   :  { %1675 = vrot.lane.b32.xlu1 %v3369_v55, %s2974_s19 }
 0xdf8   :  { %1581 = vrot.lane.b32.xlu0 %v3365_v45, %s2974_s19 }
 0xdfe   :  { %v2919_v26 = vpop.eup %2918 }
 0xdff   :  { %v1570_v29 = vmul.f32 %v2919_v26, %v3428_v46 }
 0xe1b   :  { %1553 = vadd.xlane.f32.xlu1 %v1552_v23 }
 0xe2c   :  { %1722 = vrot.lane.b32.xlu1 %v3377_v60, %s2974_s19 }
 0xe5b   :  { %v1545_v57 = vpop.xlane.xlu0 %1544 }
 0xe5c   :  { %2920 = vrcp.f32 %v1545_v57 }
 0xe5d   :  { %2922 = vrcp.f32 %v1539_v24 }
 0xe5f   :  { %v1548_v55 = vpop.xlane.xlu1 %1547 }
 0xe60   :  { %2924 = vrcp.f32 %v1548_v55 }
 0xe67   :  { %v1557_v45 = vpop.xlane.xlu0 %1556 }
 0xe69   :  { %v2921_v27 = vpop.eup %2920 }
 0xe6a   :  { %v2923_v28 = vpop.eup %2922  ;;  %v1571_v30 = vmul.f32 %v2921_v27, %v2907_v10  ;;  %v1923_v10 = vsel %vm693_vm4, %v2436_v2, 0 }
 0xe6b   :  { %v1551_v49 = vpop.xlane.xlu0 %1550  ;;  %v1560_v54 = vpop.xlane.xlu1 %1559  ;;  %v1569_v33 = vmul.f32 %v2923_v28, %v3424_v44 }
 0xe6c   :  { %2926 = vrcp.f32 %v1560_v54 }
 0xe6d   :  { %v2925_v50 = vpop.eup %2924  ;;  %v1577_v35 = vpack.c.bf16 %v1570_v29, %v1569_v33  ;;  %2928 = vrcp.f32 %v1557_v45 }
 0xe6e   :  { %v1572_v31 = vmul.f32 %v2925_v50, %v2909_v13  ;;  %2930 = vrcp.f32 %v1551_v49  ;;  %v1876_v13 = vsel %vm693_vm4, %v2435_v1, 0 }
 0xe6f   :  { %v1582_v60 = vpop.permute.xlu0 %1581  ;;  %v1629_v32 = vpop.permute.xlu1 %1628 }
 0xe70   :  { %2708 = vmatpush3.bf16.msra.mxu1 %v1582_v60  ;;  %2714 = vmatpush3.bf16.msra.mxu0 %v1629_v32  ;;  %v1578_v34 = vpack.c.bf16 %v1572_v31, %v1571_v30 }
 0xe71   :  { %2719 = vmatprep.subr.bf16.mxu1 %v2968_v15  ;;  %2725 = vmatprep.subr.bf16.mxu0 %v2968_v15 }
 0xe73   :  { %2710 = vmatmul.mubr.msk.bf16.vlgmr.msra.gmra.mxu1 %vm401_vm3, %v1577_v35  ;;  %2716 = vmatmul.mubr.msk.bf16.vlgmr.msra.gmra.mxu0 %vm401_vm3, %v1578_v34  ;;  %v1676_v36 = vpop.permute.xlu1 %1675 }
 0xe74   :  { %2720 = vmatpush3.bf16.msra.mxu1 %v1676_v36  ;;  %2727 = vmatprep.mubr.msk.bf16.mxu0 %vm2969_vm1, %v2968_v15 }
 0xe75   :  { %2721 = vmatprep.mubr.msk.bf16.mxu1 %vm2969_vm1, %v2968_v15  ;;  %2731 = vmatprep.subr.bf16.mxu1 %v2968_v15 }
 0xe79   :  { %v2927_v37 = vpop.eup %2926 }
 0xe7a   :  { %v2929_v38 = vpop.eup %2928  ;;  %v1576_v39 = vmul.f32 %v2927_v37, %v2915_v18 }
 0xe7b   :  { %v1575_v41 = vmul.f32 %v2929_v38, %v2911_v14  ;;  %v2931_v44 = vpop.eup %2930 }
 0xe7c   :  { %v1573_v46 = vmul.f32 %v2931_v44, %v3435_v17 }
 0xe7d   :  { %v1580_v43 = vpack.c.bf16 %v1576_v39, %v1575_v41  ;;  %v2442_v41 = vld [vmem:[%s3612_s7 + $0x1] ss:$0 sm:$0xff] }
 0xea4   :  { %v1554_v63 = vpop.xlane.xlu1 %1553 }
 0xea5   :  { %2932 = vrcp.f32 %v1554_v63 }
 0xea8   :  { %v1723_v40 = vpop.permute.xlu1 %1722 }
 0xea9   :  { %2726 = vmatpush3.bf16.msra.mxu0 %v1723_v40 }
 0xeaa   :  { %2737 = vmatprep.subr.bf16.mxu0 %v2968_v15 }
 0xeac   :  { %2728 = vmatmul.mubr.msk.bf16.vlgmr.msra.gmra.mxu0 %vm401_vm3, %v1580_v43 }
 0xead   :  { %2739 = vmatprep.mubr.msk.bf16.mxu0 %vm2969_vm1, %v2968_v15  ;;  %2738 = vmatpush3.bf16.msra.mxu0 %v1829_v0 }
 0xeae   :  { %2749 = vmatprep.subr.bf16.mxu0 %v2968_v15 }
 0xeb2   :  { %v2933_v5 = vpop.eup %2932 }
 0xeb3   :  { %v1574_v47 = vmul.f32 %v2933_v5, %v2917_v22 }
 0xeb5   :  { %v1579_v48 = vpack.c.bf16 %v1574_v47, %v1573_v46 }
 0xeb7   :  { %2722 = vmatmul.mubr.msk.bf16.vlgmr.msra.gmra.mxu1 %vm401_vm3, %v1579_v48 }
 0xeb8   :  { %2732 = vmatpush3.bf16.msra.mxu1 %v1782_v53  ;;  %2733 = vmatprep.mubr.msk.bf16.mxu1 %vm2969_vm1, %v2968_v15 }
 0xeb9   :  { %2743 = vmatprep.subr.bf16.mxu1 %v2968_v15 }
 0xf33   :  { %v1621_v58 = vpop.f32.mrf.mxu1  ;;  %v1668_v59 = vpop.f32.mrf.mxu0 }
 0xf35   :  { %v2711_v61 = vpop.f32.mrf.mxu1  ;;  %v2717_v62 = vpop.f32.mrf.mxu0 }
 0xf37   :  { %v1624_v4 = vpop.f32.mrf.mxu1  ;;  %v1671_v6 = vpop.f32.mrf.mxu0 }
 0xf38   :  { %v1769_v7 = vpack.c.bf16 %v1624_v4, %v1621_v58  ;;  %v1770_v8 = vpack.c.bf16 %v1671_v6, %v1668_v59 }
 0xf39   :  { %v2712_v11 = vpop.f32.mrf.mxu1  ;;  %v2718_v12 = vpop.f32.mrf.mxu0 }
 0xf3a   :  { %2734 = vmatmul.mubr.msk.bf16.vlgmr.msra.gmra.mxu1 %vm203_vm2, %v1769_v7  ;;  %2740 = vmatmul.mubr.msk.bf16.vlgmr.msra.gmra.mxu0 %vm203_vm2, %v1770_v8  ;;  %v2838_v7 = vld [vmem:[%s3615_s10 + $0x18] sm:$0xff]   ;;  %v2839_v8 = vld [vmem:[%s3615_s10 + $0x10] sm:$0xff]  }
 0xf3b   :  { %2750 = vmatpush3.bf16.msra.mxu0 %v1923_v10  ;;  %2751 = vmatprep.mubr.msk.bf16.mxu0 %vm2969_vm1, %v2968_v15 }
 0xf3c   :  { %2744 = vmatpush3.bf16.msra.mxu1 %v1876_v13  ;;  %2745 = vmatprep.mubr.msk.bf16.mxu1 %vm2969_vm1, %v2968_v15 }
 0xf3d   :  { %2755 = vmatprep.subr.bf16.mxu1 %v2968_v15  ;;  %2763 = vmatprep.subr.bf16.mxu0 %v2968_v15 }
 0xf6c   :  { %v1762_v52 = vpop.f32.mrf.mxu0 }
 0xf6e   :  { %v2729_v14 = vpop.f32.mrf.mxu0 }
 0xf70   :  { %v1765_v16 = vpop.f32.mrf.mxu0 }
 0xf71   :  { %v1772_v17 = vpack.c.bf16 %v1765_v16, %v1762_v52 }
 0xf72   :  { %v2730_v18 = vpop.f32.mrf.mxu0 }
 0xf73   :  { %2752 = vmatmul.mubr.msk.bf16.vlgmr.msra.gmra.mxu0 %vm203_vm2, %v1772_v17  ;;  %v2445_v18 = vld [vmem:[%s3613_s8 + $0x1] ss:$0 sm:$0xff] }
 0xf74   :  { %2779 = vmatprep.mubr.msk.bf16.mxu0 %vm2969_vm1, %v2968_v15 }
 0xf77   :  { %v1715_v19 = vpop.f32.mrf.mxu1 }
 0xf79   :  { %v2723_v56 = vpop.f32.mrf.mxu1 }
 0xf7b   :  { %v1718_v20 = vpop.f32.mrf.mxu1 }
 0xf7c   :  { %v1771_v21 = vpack.c.bf16 %v1718_v20, %v1715_v19 }
 0xf7d   :  { %v2724_v22 = vpop.f32.mrf.mxu1 }
 0xf7e   :  { %2746 = vmatmul.mubr.msk.bf16.vlgmr.msra.gmra.mxu1 %vm203_vm2, %v1771_v21  ;;  %v2446_v21 = vld [vmem:[%s3614_s9 + $0x1] ss:$0 sm:$0xff]  ;;  %s2976_s9 = smov [#allocation2]  }
 0xf7f   :  { %2759 = vmatprep.mubr.msk.bf16.mxu1 %vm2969_vm1, %v2968_v15  ;;  %2756 = vmatpush3.bf16.msra.mxu1 %v2838_v7  ;;  %s2367_s29 = sshll.u32 %s2976_s9, 4  ;;  %s2368_s29 = int_to_ptr.vmem [resolvable:$true] %s2367_s29 }
 0xf80   :  { %2757 = vmatprep.subr.bf16.mxu1 %v2968_v15  ;;  %p2951_p1 = scmp.lt.s32.totalorder %s2368_s29, %s2368_s29 }
 0xf83   :  { %2758 = vmatpush3.bf16.msra.mxu1 %v2839_v8 }
 0xffa   :  { %v1818_v23 = vpop.f32.mrf.mxu1  ;;  %v1865_v24 = vpop.f32.mrf.mxu0 }
 0xffb   :  { %v1966_v25 = vsel %vm64_vm0, %v1818_v23, 0.0  ;;  %v1967_v57 = vsel %vm64_vm0, %v1865_v24, 0.0 }
 0xffc   :  { %v1968_v55 = vadd.f32 %v1967_v57, %v1966_v25  ;;  %v2735_v45 = vpop.f32.mrf.mxu1  ;;  %v2741_v26 = vpop.f32.mrf.mxu0  ;;  %v2840_v57 = vld [vmem:[%s3617_s12 + $0x78] sm:$0xff]  }
 0xffd   :  { %2764 = vmatpush3.bf16.msra.mxu0 %v2840_v57  ;;  %v2842_v45 = vld [vmem:[%s3617_s12 + $0x68] sm:$0xff]   ;;  %v2843_v26 = vld [vmem:[%s3617_s12 + $0x60] sm:$0xff]  }
 0xffe   :  { %v1821_v27 = vpop.f32.mrf.mxu1  ;;  %v1868_v49 = vpop.f32.mrf.mxu0  ;;  %2765 = vmatprep.subr.bf16.mxu0 %v2968_v15 }
 0xfff   :  { %v1973_v54 = vsel %vm64_vm0, %v1821_v27, 0.0  ;;  %v1974_v28 = vsel %vm64_vm0, %v1868_v49, 0.0  ;;  %v2844_v27 = vld [vmem:[%s3617_s12 + $0x58] sm:$0xff]   ;;  %v2845_v49 = vld [vmem:[%s3617_s12 + $0x50] sm:$0xff]  }
0x1000   :  { %v1975_v50 = vadd.f32 %v1974_v28, %v1973_v54  ;;  %v2736_v29 = vpop.f32.mrf.mxu1  ;;  %v2742_v30 = vpop.f32.mrf.mxu0  ;;  %v2846_v54 = vld [vmem:[%s3617_s12 + $0x48] sm:$0xff]   ;;  %v2847_v28 = vld [vmem:[%s3617_s12 + $0x40] sm:$0xff]  }
0x1033   :  { %v1959_v31 = vpop.f32.mrf.mxu0 }
0x1034   :  { %v1971_v63 = vsel %vm64_vm0, %v1959_v31, 0.0 }
0x1035   :  { %v2753_v60 = vpop.f32.mrf.mxu0 }
0x1037   :  { %v1962_v32 = vpop.f32.mrf.mxu0 }
0x1038   :  { %v1978_v46 = vsel %vm64_vm0, %v1962_v32, 0.0 }
0x1039   :  { %v2754_v33 = vpop.f32.mrf.mxu0 }
0x103e   :  { %v1912_v34 = vpop.f32.mrf.mxu1 }
0x103f   :  { %v1969_v35 = vsel %vm64_vm0, %v1912_v34, 0.0 }
0x1040   :  { %v1970_v36 = vadd.f32 %v1969_v35, %v1968_v55  ;;  %v2747_v37 = vpop.f32.mrf.mxu1  ;;  %v2841_v55 = vld [vmem:[%s3617_s12 + $0x70] sm:$0xff]  }
0x1041   :  { %2766 = vmatpush3.bf16.msra.mxu0 %v2841_v55 }
0x1042   :  { %v1972_v38 = vadd.f32 %v1971_v63, %v1970_v36  ;;  %v1915_v39 = vpop.f32.mrf.mxu1  ;;  %2767 = vmatprep.subr.bf16.mxu0 %v2968_v15 }
0x1043   :  { %v1976_v40 = vsel %vm64_vm0, %v1915_v39, 0.0 }
0x1044   :  { %v1980_v43 = vadd.f32 %v1972_v38, %v3329_v3  ;;  %v1977_v44 = vadd.f32 %v1976_v40, %v1975_v50  ;;  %v2748_v5 = vpop.f32.mrf.mxu1  ;;  %v2452_v50 = vld [vmem:[%s3616_s11 + $0x1] ss:$0 sm:$0xff] }
0x1045   :  { %2768 = vmatpush3.bf16.msra.mxu0 %v2842_v45 }
0x1046   :  { %v1979_v47 = vadd.f32 %v1978_v46, %v1977_v44  ;;  %v3513_v48 = vadd.f32 %v2442_v41, %v1980_v43  ;;  %2769 = vmatprep.subr.bf16.mxu0 %v2968_v15 }
0x1048   :  { %v1981_v51 = vadd.f32 %v1979_v47, %v3334_v9  ;;  %v1996_v42 = vsel %vm64_vm0, %v3513_v48, 0.0 }
0x1049   :  { %1997 = vadd.xlane.f32.xlu0 %v1996_v42  ;;  %2770 = vmatpush3.bf16.msra.mxu0 %v2843_v26 }
0x104a   :  { %v3518_v53 = vadd.f32 %v2442_v41, %v1981_v51  ;;  %2771 = vmatprep.subr.bf16.mxu0 %v2968_v15 }
0x104c   :  { %v1999_v0 = vsel %vm64_vm0, %v3518_v53, 0.0 }
0x104d   :  { %2000 = vadd.xlane.f32.xlu1 %v1999_v0  ;;  %2772 = vmatpush3.bf16.msra.mxu0 %v2844_v27  ;;  %v2482_v27 = vld [vmem:[%s3619_s14] ss:$0 sm:$0xff]  ;;  %s2946_s14 = scalar_lea.vmem %s2368_s29, 512 }
0x104e   :  { %2773 = vmatprep.subr.bf16.mxu0 %v2968_v15  ;;  %p2947_p0 = scmp.ne.s32.totalorder %s2368_s29, %s2946_s14  ;;  %p2952_p2 = scmp.lt.s32.totalorder %s2946_s14, %s2946_s14 }
0x1050   :  { %p2953_p3 = por %p2952_p2, %p2951_p1 }
0x1051   :  { %2774 = vmatpush3.bf16.msra.mxu0 %v2845_v49 }
0x1052   :  { %2775 = vmatprep.subr.bf16.mxu0 %v2968_v15  ;;  %p2954_p4 = pnand %p2953_p3, %p2947_p0 }
0x1055   :  { %2776 = vmatpush3.bf16.msra.mxu0 %v2846_v54 }
0x1056   :  { %2777 = vmatprep.subr.bf16.mxu0 %v2968_v15 }
0x1059   :  { %2778 = vmatpush3.bf16.msra.mxu0 %v2847_v28 }
0x10d2   :  { %v1998_v3 = vpop.xlane.xlu0 %1997 }
0x10d3   :  { %v2002_v58 = vmul.f32 0.03125, %v1998_v3 }
0x10d5   :  { %v2004_v59 = vsub.f32 %v3513_v48, %v2002_v58  ;;  %v2473_v58 = vld [vmem:[%s3618_s13 + $0x1] ss:$0 sm:$0xff] }
0x10d6   :  { %v2001_v61 = vpop.xlane.xlu1 %2000 }
0x10d7   :  { %v2003_v62 = vmul.f32 0.03125, %v2001_v61  ;;  %v2006_v2 = vmul.f32 %v2004_v59, %v2004_v59 }
0x10d9   :  { %v2005_v1 = vsub.f32 %v3518_v53, %v2003_v62  ;;  %v2008_v9 = vsel %vm64_vm0, %v2006_v2, 0.0 }
0x10da   :  { %2009 = vadd.xlane.f32.xlu0 %v2008_v9 }
0x10db   :  { %v2007_v4 = vmul.f32 %v2005_v1, %v2005_v1 }
0x10dd   :  { %v2011_v6 = vsel %vm64_vm0, %v2007_v4, 0.0 }
0x10de   :  { %2012 = vadd.xlane.f32.xlu0 %v2011_v6 }
0x1163   :  { %v2010_v10 = vpop.xlane.xlu0 %2009 }
0x1164   :  { %v2014_v11 = vmul.f32 0.03125, %v2010_v10 }
0x1166   :  { %v2016_v12 = vadd.f32 1e-05, %v2014_v11 }
0x1167   :  { %v2013_v13 = vpop.xlane.xlu0 %2012 }
0x1168   :  { %2934 = vrsqrt.f32 %v2016_v12  ;;  %v2015_v52 = vmul.f32 0.03125, %v2013_v13 }
0x116a   :  { %v2017_v14 = vadd.f32 1e-05, %v2015_v52 }
0x116c   :  { %2936 = vrsqrt.f32 %v2017_v14 }
0x1175   :  { %v2935_v16 = vpop.eup %2934 }
0x1176   :  { %v2020_v17 = vmul.f32 %v2935_v16, %v2004_v59 }
0x1178   :  { %v2028_v20 = vmul.f32 %v2445_v18, %v2020_v17 }
0x1179   :  { %v2937_v19 = vpop.eup %2936 }
0x117a   :  { %v2021_v56 = vmul.f32 %v2937_v19, %v2005_v1  ;;  %v2036_v23 = vadd.f32 %v2446_v21, %v2028_v20  ;;  %v2848_v19 = vld [vmem:[%s3621_s16 + $0x10] ss:$8 sps:$4 sm:$0xff]   ;;  %v2851_v20 = vld [vmem:[%s3621_s16] ss:$8 sps:$4 sm:$0xff]  }
0x117c   :  { %v2029_v22 = vmul.f32 %v2445_v18, %v2021_v56  ;;  %v2853_v56 = vld [vmem:[%s3621_s16 + $0x4] ss:$8 sps:$4 sm:$0xff]  }
0x117e   :  { %v2037_v24 = vadd.f32 %v2446_v21, %v2029_v22  ;;  %v2975_v21 = vmov 0  }
0x1180   :  { %v2038_v25 = vpack.c.bf16 %v2037_v24, %v2036_v23 }
0x1182   :  { %2760 = vmatmul.mubr.msk.bf16.vlgmr.msra.gmra.mxu1 %vm64_vm0, %v2038_v25 }
0x1183   :  { %2347 = vmatprep.mubr.bf16.mxu1 %v2975_v21 }
0x1242   :  { %v2101_v29 = vpop.f32.mrf.mxu1 }
0x1243   :  { %v2102_v30 = vadd.f32 %v2452_v50, %v2101_v29 }
0x1244   :  { %v2761_v31 = vpop.f32.mrf.mxu1 }
0x1245   :  { %v2110_v60 = vmul.f32 0.044715, %v2102_v30  ;;  %v2108_v46 = vmul.f32 0.5, %v2102_v30 }
0x1246   :  { %v2104_v32 = vpop.f32.mrf.mxu1 }
0x1247   :  { %v2112_v33 = vmul.f32 %v2110_v60, %v2102_v30  ;;  %v2105_v34 = vadd.f32 %v2452_v50, %v2104_v32  ;;  %v2483_v50 = vld [vmem:[%s3620_s15] ss:$0 sm:$0xff] }
0x1248   :  { %v2762_v35 = vpop.f32.mrf.mxu1 }
0x1249   :  { %v2114_v36 = vmul.f32 %v2112_v33, %v2102_v30  ;;  %v2111_v37 = vmul.f32 0.044715, %v2105_v34  ;;  %v2109_v47 = vmul.f32 0.5, %v2105_v34 }
0x124b   :  { %v2116_v63 = vadd.f32 %v2114_v36, %v2102_v30  ;;  %v2113_v38 = vmul.f32 %v2111_v37, %v2105_v34 }
0x124d   :  { %v2118_v39 = vmul.f32 0.7978846, %v2116_v63  ;;  %v2115_v40 = vmul.f32 %v2113_v38, %v2105_v34 }
0x124f   :  { %2938 = vtanh.f32 %v2118_v39  ;;  %v2117_v15 = vadd.f32 %v2115_v40, %v2105_v34 }
0x1251   :  { %v2119_v41 = vmul.f32 0.7978846, %v2117_v15 }
0x1253   :  { %2940 = vtanh.f32 %v2119_v41 }
0x125c   :  { %v2939_v43 = vpop.eup %2938 }
0x125d   :  { %v2122_v44 = vadd.f32 1.0, %v2939_v43 }
0x125f   :  { %v2124_v42 = vmul.f32 %v2122_v44, %v2108_v46 }
0x1260   :  { %v2941_v5 = vpop.eup %2940 }
0x1261   :  { %v2123_v51 = vadd.f32 1.0, %v2941_v5 }
0x1263   :  { %v2125_v0 = vmul.f32 %v2123_v51, %v2109_v47 }
0x1265   :  { %v2126_v3 = vpack.c.bf16 %v2125_v0, %v2124_v42 }
0x1267   :  { %2780 = vmatmul.mubr.bf16.vlgmr.msra.gmra.mxu0 %v2126_v3 }
0x1327   :  { %v2234_v59 = vpop.f32.mrf.mxu0 }
0x1328   :  { %v2235_v61 = vadd.f32 %v2473_v58, %v2234_v59 }
0x1329   :  { %v2781_v62 = vpop.f32.mrf.mxu0 }
0x132a   :  { %v2241_v2 = vadd.f32 %v2235_v61, %v3513_v48 }
0x132b   :  { %v2237_v1 = vpop.f32.mrf.mxu0 }
0x132c   :  { %v2238_v9 = vadd.f32 %v2473_v58, %v2237_v1  ;;  %v2245_v4 = vsel %vm64_vm0, %v2241_v2, 0.0 }
0x132d   :  { %2246 = vadd.xlane.f32.xlu0 %v2245_v4  ;;  %v2782_v6 = vpop.f32.mrf.mxu0 }
0x132e   :  { %v2242_v7 = vadd.f32 %v2238_v9, %v3518_v53  ;;  %v2850_v53 = vld [vmem:[%s3621_s16 + $0x14] ss:$8 sps:$4 sm:$0xff]  }
0x132f   :  { %2327 = vmatprep.subr.bf16.mxu1 %v2850_v53 }
0x1330   :  { %v2248_v8 = vsel %vm64_vm0, %v2242_v7, 0.0  ;;  %2328 = vmatpush1.bf16.msra.mxu1 %v2848_v19 }
0x1331   :  { %2249 = vadd.xlane.f32.xlu1 %v2248_v8  ;;  %2329 = vmatprep.subr.bf16.mxu1 %v2853_v56 }
0x1334   :  { %2330 = vmatpush1.bf16.msra.mxu1 %v2851_v20 }
0x13b6   :  { %v2247_v10 = vpop.xlane.xlu0 %2246 }
0x13b7   :  { %v2251_v11 = vmul.f32 0.03125, %v2247_v10 }
0x13b9   :  { %v2253_v12 = vsub.f32 %v2241_v2, %v2251_v11 }
0x13ba   :  { %v2250_v13 = vpop.xlane.xlu1 %2249 }
0x13bb   :  { %v2252_v52 = vmul.f32 0.03125, %v2250_v13  ;;  %v2255_v14 = vmul.f32 %v2253_v12, %v2253_v12 }
0x13bd   :  { %v2254_v16 = vsub.f32 %v2242_v7, %v2252_v52  ;;  %v2257_v48 = vsel %vm64_vm0, %v2255_v14, 0.0 }
0x13be   :  { %2258 = vadd.xlane.f32.xlu0 %v2257_v48 }
0x13bf   :  { %v2256_v17 = vmul.f32 %v2254_v16, %v2254_v16 }
0x13c1   :  { %v2260_v18 = vsel %vm64_vm0, %v2256_v17, 0.0 }
0x13c2   :  { %2261 = vadd.xlane.f32.xlu1 %v2260_v18 }
0x1447   :  { %v2259_v22 = vpop.xlane.xlu0 %2258 }
0x1448   :  { %v2263_v23 = vmul.f32 0.03125, %v2259_v22 }
0x144a   :  { %v2265_v24 = vadd.f32 1e-05, %v2263_v23 }
0x144b   :  { %v2262_v25 = vpop.xlane.xlu1 %2261 }
0x144c   :  { %2942 = vrsqrt.f32 %v2265_v24  ;;  %v2264_v57 = vmul.f32 0.03125, %v2262_v25 }
0x144e   :  { %v2266_v55 = vadd.f32 1e-05, %v2264_v57 }
0x1450   :  { %2944 = vrsqrt.f32 %v2266_v55 }
0x1459   :  { %v2943_v45 = vpop.eup %2942 }
0x145a   :  { %v2269_v26 = vmul.f32 %v2943_v45, %v2253_v12 }
0x145c   :  { %v2277_v28 = vmul.f32 %v2482_v27, %v2269_v26 }
0x145d   :  { %v2945_v49 = vpop.eup %2944 }
0x145e   :  { %v2270_v54 = vmul.f32 %v2945_v49, %v2254_v16  ;;  %v2285_v30 = vadd.f32 %v2483_v50, %v2277_v28 }
0x1460   :  { %v2278_v29 = vmul.f32 %v2482_v27, %v2270_v54 }
0x1462   :  { %v2286_v31 = vadd.f32 %v2483_v50, %v2278_v29 }
0x1464   :  { %v2287_v60 = vpack.c.bf16 %v2286_v31, %v2285_v30 }
0x1466   :  { %2488 = vmatmul.mubr.msk.bf16.vlgmr.msra.gmra.mxu1 %vm64_vm0, %v2287_v60 }
0x1526   :  { %v2349_v32 = vpop.f32.mrf.mxu1 }
0x1527   :  { %2358 = vst [vmem:[#allocation2] sm:$0xff] %v2349_v32 }
0x1528   :  { %v2351_v33 = vpop.f32.mrf.mxu1 }
0x1529   :  { %2359 = vst [vmem:[#allocation2 + $0x8] sm:$0xff] %v2351_v33 }
0x152a   :  { %v2353_v34 = vpop.f32.mrf.mxu1 }
0x152b   :  { %2360 = vst [vmem:[#allocation2 + $0x10] sm:$0xff] %v2353_v34 }
0x152c   :  { %v2355_v35 = vpop.f32.mrf.mxu1 }
0x152d   :  { %2361 = vst [vmem:[#allocation2 + $0x18] sm:$0xff] %v2355_v35 }
0x152e   :  { %2957 = shalt.err (!%p2954_p4)
}
0x152f   :  { %s2977_s15 = smov 256   ;;  %s2978_s2 = smov 16  }
0x1530   :  { %2373 = dma.vmem_to_hbm [thread:$0]  %s2368_s29, 512, %s3622_s17, [#allocation3], %s2977_s15, %s2977_s15, %s2978_s2  }
0x1531   :  { %2966 = dma.done.wait [#allocation3], 512  }
0x1532   :  { %2967 = vsyncadd [#allocation3], 4294966784 }
0x1533   :  { %2377 = vsyncpa [#allocation3], 1 }

</bundles_post_ra>
